<compile_context>
chip_gen: v7x
topology: tpu7x:2x2x1
jax: 0.10.0
libtpu: 0.0.40
codegen_flags: <defaults>
</compile_context>

<pallas_src>
import jax
import jax.numpy as jnp
from jax import lax
from jax.experimental import pallas as pl
from jax.experimental.pallas import tpu as pltpu

LRELU_SLOPE = 0.1


def get_padding(kernel_size, dilation=1):
    return int((kernel_size * dilation - dilation) / 2)


def _leaky(x, slope):
    return jnp.where(x >= 0, x, slope * x)


# ---------------------------------------------------------------------------
# In-kernel building blocks (pure functions on (C, T) values)
# ---------------------------------------------------------------------------
def _zero_pad_t(x, lo, hi):
    """Zero-pad the time (last, lane) axis of a (C, T) value inside the kernel."""
    if lo == 0 and hi == 0:
        return x
    parts = []
    if lo:
        parts.append(jnp.zeros((x.shape[0], lo), x.dtype))
    parts.append(x)
    if hi:
        parts.append(jnp.zeros((x.shape[0], hi), x.dtype))
    return jnp.concatenate(parts, axis=1)


def _conv(x, wb, c, pre_slope=None):
    """Dilated Conv1d (stride 1) as a single MXU matmul via im2col.

    x  : (Cin, T) f32 value
    wb : {'w': (Cout, K*Cin) bf16 ref, 'b': (Cout, 1) f32 ref}
         with W[co, k*Cin + ci] == torch_w[co, ci, k]
    """
    K, dil, pad = c['K'], c['dil'], c['pad']
    _, T = x.shape
    if pre_slope is not None:
        x = _leaky(x, pre_slope)
    T_out = T + 2 * pad - (K - 1) * dil
    xp = _zero_pad_t(x, pad, pad)
    w = wb['w'][...]
    b = wb['b'][...]
    cols = [xp[:, j * dil:j * dil + T_out] for j in range(K)]
    xcol = cols[0] if K == 1 else jnp.concatenate(cols, axis=0)  # (K*Cin, T_out)
    y = jnp.dot(w, xcol.astype(w.dtype), preferred_element_type=jnp.float32)
    return y + b


def _conv_transpose(x, wb, c, pre_slope=None):
    """ConvTranspose1d = zero-stuff + conv with flipped taps, fully in-kernel.

    Zero-stuffing uses a 0/1 selection matmul (MXU is otherwise idle; avoids
    strided scatters inside Mosaic).
    """
    K, stride, pad = c['K'], c['stride'], c['pad']
    _, T = x.shape
    if pre_slope is not None:
        x = _leaky(x, pre_slope)
    if stride > 1:
        up_len = (T - 1) * stride + 1
        src = lax.broadcasted_iota(jnp.int32, (T, up_len), 0)
        dst = lax.broadcasted_iota(jnp.int32, (T, up_len), 1)
        sel = (dst == src * stride).astype(x.dtype)           # (T, up_len)
        x = jnp.dot(x, sel, preferred_element_type=jnp.float32)
    p = K - 1 - pad
    T_out = (T - 1) * stride + K - 2 * pad
    xp = _zero_pad_t(x, p, p)
    w = wb['w'][...]
    b = wb['b'][...]
    cols = [xp[:, j:j + T_out] for j in range(K)]
    xcol = jnp.concatenate(cols, axis=0)
    y = jnp.dot(w, xcol.astype(w.dtype), preferred_element_type=jnp.float32)
    return y + b


def _resblock(x, p, c):
    if c['kind'] == '1':
        for wb1, wb2, c1, c2 in zip(p['convs1'], p['convs2'],
                                    c['convs1'], c['convs2']):
            xt = _conv(x, wb1, c1, pre_slope=LRELU_SLOPE)
            xt = _conv(xt, wb2, c2, pre_slope=LRELU_SLOPE)
            x = xt + x
    else:
        for wb, cc in zip(p['convs'], c['convs']):
            xt = _conv(x, wb, cc, pre_slope=LRELU_SLOPE)
            x = xt + x
    return x


def _forward_one(x, p, cfg):
    """Full iSTFTNet forward for one batch element.  x: (80, T) f32.

    NOTE: p['conv_post'] is expected to hold only the phase rows
    (channels n_fft//2+1 .. n_fft+1), pre-sliced by the wrapper.
    """
    x = _conv(x, p['conv_pre'], cfg['conv_pre'])
    nk = cfg['num_kernels']
    inv_nk = 1.0 / nk
    for i in range(cfg['num_upsamples']):
        # leaky_relu(0.1) fused as pre-activation of the transposed conv
        x = _conv_transpose(x, p['ups'][i], cfg['ups'][i], pre_slope=LRELU_SLOPE)
        acc = None
        for j in range(nk):
            idx = i * nk + j
            y = _resblock(x, p['resblocks'][idx], cfg['resblocks'][idx])
            acc = y if acc is None else acc + y
        x = acc * inv_nk
    x = _leaky(x, 0.01)                                   # F.leaky_relu default slope
    x = jnp.concatenate([x[:, 1:2], x], axis=1)           # ReflectionPad1d((1, 0))
    x = _conv(x, p['conv_post'], cfg['conv_post'])        # phase rows only
    return jnp.sin(x)                                     # EUP, free alongside MXU/VPU


def _make_kernel(treedef, cfg):
    def kernel(*refs):
        x_ref, o_ref = refs[0], refs[-1]
        p = jax.tree_util.tree_unflatten(treedef, refs[1:-1])  # refs in a pytree
        x = x_ref[0].astype(jnp.float32)                       # (80, T)
        y = _forward_one(x, p, cfg)                            # (n_fft//2+1, T_out)
        o_ref[0] = y.astype(o_ref.dtype)
    return kernel


# ---------------------------------------------------------------------------
# Static config + parameters
# ---------------------------------------------------------------------------
class HParams:
    resblock = '2'
    resblock_kernel_sizes = [3, 5]
    resblock_dilation_sizes = [[1, 3], [1, 3]]
    upsample_rates = [2, 2]
    upsample_kernel_sizes = [4, 4]
    upsample_initial_channel = 32
    gen_istft_n_fft = 16


def build_cfg(h):
    cfg = dict(
        n_fft=h.gen_istft_n_fft,
        num_kernels=len(h.resblock_kernel_sizes),
        num_upsamples=len(h.upsample_rates),
        conv_pre=dict(K=7, dil=1, pad=3),
        conv_post=dict(K=7, dil=1, pad=3),
        ups=[dict(K=k, stride=u, pad=(k - u) // 2)
             for u, k in zip(h.upsample_rates, h.upsample_kernel_sizes)],
        resblocks=[],
    )
    for _ in range(len(h.upsample_rates)):
        for k, d in zip(h.resblock_kernel_sizes, h.resblock_dilation_sizes):
            if h.resblock == '1':
                rb = dict(kind='1',
                          convs1=[dict(K=k, dil=dj, pad=get_padding(k, dj)) for dj in d],
                          convs2=[dict(K=k, dil=1, pad=get_padding(k, 1)) for _ in d])
            else:
                rb = dict(kind='2',
                          convs=[dict(K=k, dil=dj, pad=get_padding(k, dj)) for dj in d])
            cfg['resblocks'].append(rb)
    return cfg


def init_params(h, key, wdtype=jnp.bfloat16):
    """Effective (weight-norm-folded) weights in MXU-friendly layout."""
    keys = iter(jax.random.split(key, 256))

    def nrm(shape, std=0.01):
        return std * jax.random.normal(next(keys), shape, jnp.float32)

    def conv_wb(cout, cin, k):
        w = nrm((cout, cin, k))                                    # torch Conv1d layout
        wm = jnp.transpose(w, (0, 2, 1)).reshape(cout, k * cin)    # row index = k*Cin+ci
        return dict(w=wm.astype(wdtype), b=nrm((cout, 1)))

    def convT_wb(cin, cout, k):
        w = nrm((cin, cout, k))                                    # torch ConvTranspose1d layout
        wf = jnp.flip(w, axis=2)                                   # flipped taps
        wm = jnp.transpose(wf, (1, 2, 0)).reshape(cout, k * cin)
        return dict(w=wm.astype(wdtype), b=nrm((cout, 1)))

    params = dict(conv_pre=conv_wb(h.upsample_initial_channel, 80, 7))

    params['ups'] = []
    for i, (u, k) in enumerate(zip(h.upsample_rates, h.upsample_kernel_sizes)):
        cin = h.upsample_initial_channel // 2 ** i
        cout = h.upsample_initial_channel // 2 ** (i + 1)
        params['ups'].append(convT_wb(cin, cout, k))

    params['resblocks'] = []
    for i in range(len(h.upsample_rates)):
        ch = h.upsample_initial_channel // 2 ** (i + 1)
        for k, d in zip(h.resblock_kernel_sizes, h.resblock_dilation_sizes):
            if h.resblock == '1':
                rb = dict(convs1=[conv_wb(ch, ch, k) for _ in d],
                          convs2=[conv_wb(ch, ch, k) for _ in d])
            else:
                rb = dict(convs=[conv_wb(ch, ch, k) for _ in d])
            params['resblocks'].append(rb)

    ch = h.upsample_initial_channel // 2 ** len(h.upsample_rates)
    params['conv_post'] = conv_wb(h.gen_istft_n_fft + 2, ch, 7)
    return params


def _out_time(cfg, T):
    t = T                                     # conv_pre preserves length
    for c in cfg['ups']:
        t = (t - 1) * c['stride'] + c['K'] - 2 * c['pad']
    return t + 1                              # reflection pad (1,0); conv_post preserves length


def _cost_estimate(h, params, B, T):
    flops = 0

    def add(wb, t):
        nonlocal flops
        cout, kcin = wb['w'].shape
        flops += 2 * int(cout) * int(kcin) * int(t)

    t = T
    add(params['conv_pre'], t)
    nk = len(h.resblock_kernel_sizes)
    for i, u in enumerate(h.upsample_rates):
        t = t * u
        add(params['ups'][i], t)
        for j in range(nk):
            rb = params['resblocks'][i * nk + j]
            for key in ('convs', 'convs1', 'convs2'):
                for wb in rb.get(key, []):
                    add(wb, t)
    t_final = t + 1
    add(params['conv_post'], t_final)
    flops *= B
    c_out = h.gen_istft_n_fft // 2 + 1
    leaves = jax.tree_util.tree_leaves(params)
    weight_bytes = sum(int(l.size) * l.dtype.itemsize for l in leaves)
    bytes_accessed = weight_bytes + B * 80 * T * 4 + B * c_out * t_final * 4
    return pl.CostEstimate(flops=flops,
                           transcendentals=B * c_out * t_final,
                           bytes_accessed=bytes_accessed)


# ---------------------------------------------------------------------------
# Forward (single fused pallas_call)
# ---------------------------------------------------------------------------
def istftnet_forward(params, h, x_ncl):
    """x_ncl: (B, 80, T) mel (PyTorch NCL layout).  Returns phase (B, n_fft//2+1, T_out)."""
    B, c_mel, T = x_ncl.shape
    cfg = build_cfg(h)
    n_fft = h.gen_istft_n_fft
    c_final = n_fft // 2 + 1
    t_final = _out_time(cfg, T)

    # Only the phase rows of conv_post are ever used by the module's forward;
    # slice them out here (XLA-side, once) so the kernel computes exactly what
    # it returns.
    kparams = dict(params)
    kparams['conv_post'] = dict(w=params['conv_post']['w'][n_fft // 2 + 1:, :],
                                b=params['conv_post']['b'][n_fft // 2 + 1:, :])

    leaves, treedef = jax.tree_util.tree_flatten(kparams)
    kernel = _make_kernel(treedef, cfg)

    in_specs = [pl.BlockSpec((1, c_mel, T), lambda b: (b, 0, 0))]
    for lf in leaves:
        in_specs.append(pl.BlockSpec(lf.shape, lambda b, _nd=lf.ndim: (0,) * _nd))
    out_spec = pl.BlockSpec((1, c_final, t_final), lambda b: (b, 0, 0))

    # TODO(synk): for production-length mels the whole sequence will not fit a
    # single VMEM block (v7x: 64 MiB total); add a time-tiled grid axis with a
    # (K-1)*dilation halo in the index_maps.
    return pl.pallas_call(
        kernel,
        out_shape=jax.ShapeDtypeStruct((B, c_final, t_final), jnp.float32),
        grid=(B,),
        in_specs=in_specs,
        out_specs=out_spec,
        compiler_params=pltpu.CompilerParams(
            dimension_semantics=("parallel",)),
        cost_estimate=_cost_estimate(h, params, B, T),
    )(x_ncl.astype(jnp.float32), *leaves)


# ---------------------------------------------------------------------------
if __name__ == "__main__":
    h = HParams()
    key = jax.random.PRNGKey(0)
    k_params, k_x = jax.random.split(key)

    params = init_params(h, k_params)

    B, T = 2, 8
    x = jax.random.normal(k_x, (B, 80, T), jnp.float32)   # mel-spectrogram input

    fwd = jax.jit(lambda p, xx: istftnet_forward(p, h, xx))
    phase = fwd(params, x)
    phase = jax.block_until_ready(phase)

    # Expected output shape: (B, n_fft//2 + 1, T * prod(upsample_rates) + 1)
    exp_T = T * 2 * 2 + 1
    exp_C = h.gen_istft_n_fft // 2 + 1
    assert phase.shape == (B, exp_C, exp_T), phase.shape
    assert bool(jnp.all(jnp.isfinite(phase)))
    assert bool(jnp.all(jnp.abs(phase) <= 1.0 + 1e-6))  # sin output range

    print("KERNEL_OK")
</pallas_src>

<mosaic_0001>
module attributes {stable_mosaic.version = 11 : i64} {
  func.func @kernel(%arg0: i32, %arg1: memref<1x80x8xf32, #tpu.memory_space<vmem>>, %arg2: memref<9x1xf32, #tpu.memory_space<vmem>>, %arg3: memref<9x56xbf16, #tpu.memory_space<vmem>>, %arg4: memref<32x1xf32, #tpu.memory_space<vmem>>, %arg5: memref<32x560xbf16, #tpu.memory_space<vmem>>, %arg6: memref<16x1xf32, #tpu.memory_space<vmem>>, %arg7: memref<16x48xbf16, #tpu.memory_space<vmem>>, %arg8: memref<16x1xf32, #tpu.memory_space<vmem>>, %arg9: memref<16x48xbf16, #tpu.memory_space<vmem>>, %arg10: memref<16x1xf32, #tpu.memory_space<vmem>>, %arg11: memref<16x80xbf16, #tpu.memory_space<vmem>>, %arg12: memref<16x1xf32, #tpu.memory_space<vmem>>, %arg13: memref<16x80xbf16, #tpu.memory_space<vmem>>, %arg14: memref<8x1xf32, #tpu.memory_space<vmem>>, %arg15: memref<8x24xbf16, #tpu.memory_space<vmem>>, %arg16: memref<8x1xf32, #tpu.memory_space<vmem>>, %arg17: memref<8x24xbf16, #tpu.memory_space<vmem>>, %arg18: memref<8x1xf32, #tpu.memory_space<vmem>>, %arg19: memref<8x40xbf16, #tpu.memory_space<vmem>>, %arg20: memref<8x1xf32, #tpu.memory_space<vmem>>, %arg21: memref<8x40xbf16, #tpu.memory_space<vmem>>, %arg22: memref<16x1xf32, #tpu.memory_space<vmem>>, %arg23: memref<16x128xbf16, #tpu.memory_space<vmem>>, %arg24: memref<8x1xf32, #tpu.memory_space<vmem>>, %arg25: memref<8x64xbf16, #tpu.memory_space<vmem>>, %arg26: memref<1x9x33xf32, #tpu.memory_space<vmem>>) attributes {dimension_semantics = [#tpu.dimension_semantics<parallel>], iteration_bounds = array<i64: 2>, scalar_prefetch = 0 : i64, scratch_operands = 0 : i64, tpu.core_type = #tpu.core_type<tc>, window_params = [{transform_indices = @transform_0, window_bounds = array<i64: 1, 80, 8>}, {pipeline_mode = #tpu.pipeline_mode<synchronous>, transform_indices = @transform_1, window_bounds = array<i64: 9, 1>}, {pipeline_mode = #tpu.pipeline_mode<synchronous>, transform_indices = @transform_2, window_bounds = array<i64: 9, 56>}, {pipeline_mode = #tpu.pipeline_mode<synchronous>, transform_indices = @transform_3, window_bounds = array<i64: 32, 1>}, {pipeline_mode = #tpu.pipeline_mode<synchronous>, transform_indices = @transform_4, window_bounds = array<i64: 32, 560>}, {pipeline_mode = #tpu.pipeline_mode<synchronous>, transform_indices = @transform_5, window_bounds = array<i64: 16, 1>}, {pipeline_mode = #tpu.pipeline_mode<synchronous>, transform_indices = @transform_6, window_bounds = array<i64: 16, 48>}, {pipeline_mode = #tpu.pipeline_mode<synchronous>, transform_indices = @transform_7, window_bounds = array<i64: 16, 1>}, {pipeline_mode = #tpu.pipeline_mode<synchronous>, transform_indices = @transform_8, window_bounds = array<i64: 16, 48>}, {pipeline_mode = #tpu.pipeline_mode<synchronous>, transform_indices = @transform_9, window_bounds = array<i64: 16, 1>}, {pipeline_mode = #tpu.pipeline_mode<synchronous>, transform_indices = @transform_10, window_bounds = array<i64: 16, 80>}, {pipeline_mode = #tpu.pipeline_mode<synchronous>, transform_indices = @transform_11, window_bounds = array<i64: 16, 1>}, {pipeline_mode = #tpu.pipeline_mode<synchronous>, transform_indices = @transform_12, window_bounds = array<i64: 16, 80>}, {pipeline_mode = #tpu.pipeline_mode<synchronous>, transform_indices = @transform_13, window_bounds = array<i64: 8, 1>}, {pipeline_mode = #tpu.pipeline_mode<synchronous>, transform_indices = @transform_14, window_bounds = array<i64: 8, 24>}, {pipeline_mode = #tpu.pipeline_mode<synchronous>, transform_indices = @transform_15, window_bounds = array<i64: 8, 1>}, {pipeline_mode = #tpu.pipeline_mode<synchronous>, transform_indices = @transform_16, window_bounds = array<i64: 8, 24>}, {pipeline_mode = #tpu.pipeline_mode<synchronous>, transform_indices = @transform_17, window_bounds = array<i64: 8, 1>}, {pipeline_mode = #tpu.pipeline_mode<synchronous>, transform_indices = @transform_18, window_bounds = array<i64: 8, 40>}, {pipeline_mode = #tpu.pipeline_mode<synchronous>, transform_indices = @transform_19, window_bounds = array<i64: 8, 1>}, {pipeline_mode = #tpu.pipeline_mode<synchronous>, transform_indices = @transform_20, window_bounds = array<i64: 8, 40>}, {pipeline_mode = #tpu.pipeline_mode<synchronous>, transform_indices = @transform_21, window_bounds = array<i64: 16, 1>}, {pipeline_mode = #tpu.pipeline_mode<synchronous>, transform_indices = @transform_22, window_bounds = array<i64: 16, 128>}, {pipeline_mode = #tpu.pipeline_mode<synchronous>, transform_indices = @transform_23, window_bounds = array<i64: 8, 1>}, {pipeline_mode = #tpu.pipeline_mode<synchronous>, transform_indices = @transform_24, window_bounds = array<i64: 8, 64>}, {transform_indices = @transform_25, window_bounds = array<i64: 1, 9, 33>}]} {
    %c0 = arith.constant 0 : index
    %c0_0 = arith.constant 0 : index
    %c0_1 = arith.constant 0 : index
    %0 = vector.load %arg1[%c0, %c0_0, %c0_1] : memref<1x80x8xf32, #tpu.memory_space<vmem>>, vector<1x80x8xf32>
    %1 = vector.shape_cast %0 : vector<1x80x8xf32> to vector<80x8xf32>
    %cst = arith.constant 0.000000e+00 : f32
    %2 = vector.broadcast %cst : f32 to vector<80x3xf32>
    %cst_2 = arith.constant 0.000000e+00 : f32
    %3 = vector.broadcast %cst_2 : f32 to vector<80x3xf32>
    %4 = tpu.concatenate %2, %1, %3 in 1 : vector<80x3xf32>, vector<80x8xf32>, vector<80x3xf32> -> vector<80x14xf32>
    %c0_3 = arith.constant 0 : index
    %c0_4 = arith.constant 0 : index
    %5 = vector.load %arg5[%c0_3, %c0_4] : memref<32x560xbf16, #tpu.memory_space<vmem>>, vector<32x560xbf16>
    %c0_5 = arith.constant 0 : index
    %c0_6 = arith.constant 0 : index
    %6 = vector.load %arg4[%c0_5, %c0_6] : memref<32x1xf32, #tpu.memory_space<vmem>>, vector<32x1xf32>
    %7 = vector.extract_strided_slice %4 {offsets = [0, 0], sizes = [80, 8], strides = [1, 1]} : vector<80x14xf32> to vector<80x8xf32>
    %8 = vector.extract_strided_slice %4 {offsets = [0, 1], sizes = [80, 8], strides = [1, 1]} : vector<80x14xf32> to vector<80x8xf32>
    %9 = vector.extract_strided_slice %4 {offsets = [0, 2], sizes = [80, 8], strides = [1, 1]} : vector<80x14xf32> to vector<80x8xf32>
    %10 = vector.extract_strided_slice %4 {offsets = [0, 3], sizes = [80, 8], strides = [1, 1]} : vector<80x14xf32> to vector<80x8xf32>
    %11 = vector.extract_strided_slice %4 {offsets = [0, 4], sizes = [80, 8], strides = [1, 1]} : vector<80x14xf32> to vector<80x8xf32>
    %12 = vector.extract_strided_slice %4 {offsets = [0, 5], sizes = [80, 8], strides = [1, 1]} : vector<80x14xf32> to vector<80x8xf32>
    %13 = vector.extract_strided_slice %4 {offsets = [0, 6], sizes = [80, 8], strides = [1, 1]} : vector<80x14xf32> to vector<80x8xf32>
    %14 = tpu.concatenate %7, %8, %9, %10, %11, %12, %13 in 0 : vector<80x8xf32>, vector<80x8xf32>, vector<80x8xf32>, vector<80x8xf32>, vector<80x8xf32>, vector<80x8xf32>, vector<80x8xf32> -> vector<560x8xf32>
    %15 = arith.truncf %14 : vector<560x8xf32> to vector<560x8xbf16>
    %cst_7 = arith.constant dense<0.000000e+00> : vector<32x8xf32>
    %16 = tpu.matmul %5, %15, %cst_7 {dimension_numbers = #tpu.dot_dimension_numbers<[1], [0], [0], [1], [0, 0, 1, 1], [], []>} : vector<32x560xbf16>, vector<560x8xbf16>, vector<32x8xf32> -> vector<32x8xf32>
    %17 = vector.broadcast %6 : vector<32x1xf32> to vector<32x8xf32>
    %18 = arith.addf %16, %17 : vector<32x8xf32>
    %cst_8 = arith.constant 0.000000e+00 : f32
    %19 = vector.broadcast %cst_8 : f32 to vector<32x8xf32>
    %20 = arith.cmpf oge, %18, %19 : vector<32x8xf32>
    %cst_9 = arith.constant 1.000000e-01 : f32
    %21 = vector.broadcast %cst_9 : f32 to vector<32x8xf32>
    %22 = arith.mulf %21, %18 : vector<32x8xf32>
    %23 = arith.select %20, %18, %22 : vector<32x8xi1>, vector<32x8xf32>
    %24 = tpu.iota {dimensions = array<i32: 0>} : vector<8x15xi32>
    %25 = tpu.iota {dimensions = array<i32: 1>} : vector<8x15xi32>
    %c2_i32 = arith.constant 2 : i32
    %26 = vector.broadcast %c2_i32 : i32 to vector<8x15xi32>
    %27 = arith.muli %24, %26 : vector<8x15xi32>
    %28 = arith.cmpi eq, %25, %27 : vector<8x15xi32>
    %29 = arith.extui %28 : vector<8x15xi1> to vector<8x15xi32>
    %30 = arith.sitofp %29 : vector<8x15xi32> to vector<8x15xf32>
    %cst_10 = arith.constant dense<0.000000e+00> : vector<32x15xf32>
    %31 = tpu.matmul %23, %30, %cst_10 {dimension_numbers = #tpu.dot_dimension_numbers<[1], [0], [0], [1], [0, 0, 1, 1], [], []>} : vector<32x8xf32>, vector<8x15xf32>, vector<32x15xf32> -> vector<32x15xf32>
    %cst_11 = arith.constant 0.000000e+00 : f32
    %32 = vector.broadcast %cst_11 : f32 to vector<32x2xf32>
    %cst_12 = arith.constant 0.000000e+00 : f32
    %33 = vector.broadcast %cst_12 : f32 to vector<32x2xf32>
    %34 = tpu.concatenate %32, %31, %33 in 1 : vector<32x2xf32>, vector<32x15xf32>, vector<32x2xf32> -> vector<32x19xf32>
    %c0_13 = arith.constant 0 : index
    %c0_14 = arith.constant 0 : index
    %35 = vector.load %arg23[%c0_13, %c0_14] : memref<16x128xbf16, #tpu.memory_space<vmem>>, vector<16x128xbf16>
    %c0_15 = arith.constant 0 : index
    %c0_16 = arith.constant 0 : index
    %36 = vector.load %arg22[%c0_15, %c0_16] : memref<16x1xf32, #tpu.memory_space<vmem>>, vector<16x1xf32>
    %37 = vector.extract_strided_slice %34 {offsets = [0, 0], sizes = [32, 16], strides = [1, 1]} : vector<32x19xf32> to vector<32x16xf32>
    %38 = vector.extract_strided_slice %34 {offsets = [0, 1], sizes = [32, 16], strides = [1, 1]} : vector<32x19xf32> to vector<32x16xf32>
    %39 = vector.extract_strided_slice %34 {offsets = [0, 2], sizes = [32, 16], strides = [1, 1]} : vector<32x19xf32> to vector<32x16xf32>
    %40 = vector.extract_strided_slice %34 {offsets = [0, 3], sizes = [32, 16], strides = [1, 1]} : vector<32x19xf32> to vector<32x16xf32>
    %41 = tpu.concatenate %37, %38, %39, %40 in 0 : vector<32x16xf32>, vector<32x16xf32>, vector<32x16xf32>, vector<32x16xf32> -> vector<128x16xf32>
    %42 = arith.truncf %41 : vector<128x16xf32> to vector<128x16xbf16>
    %cst_17 = arith.constant dense<0.000000e+00> : vector<16x16xf32>
    %43 = tpu.matmul %35, %42, %cst_17 {dimension_numbers = #tpu.dot_dimension_numbers<[1], [0], [0], [1], [0, 0, 1, 1], [], []>} : vector<16x128xbf16>, vector<128x16xbf16>, vector<16x16xf32> -> vector<16x16xf32>
    %44 = vector.broadcast %36 : vector<16x1xf32> to vector<16x16xf32>
    %45 = arith.addf %43, %44 : vector<16x16xf32>
    %cst_18 = arith.constant 0.000000e+00 : f32
    %46 = vector.broadcast %cst_18 : f32 to vector<16x16xf32>
    %47 = arith.cmpf oge, %45, %46 : vector<16x16xf32>
    %cst_19 = arith.constant 1.000000e-01 : f32
    %48 = vector.broadcast %cst_19 : f32 to vector<16x16xf32>
    %49 = arith.mulf %48, %45 : vector<16x16xf32>
    %50 = arith.select %47, %45, %49 : vector<16x16xi1>, vector<16x16xf32>
    %cst_20 = arith.constant 0.000000e+00 : f32
    %51 = vector.broadcast %cst_20 : f32 to vector<16x1xf32>
    %cst_21 = arith.constant 0.000000e+00 : f32
    %52 = vector.broadcast %cst_21 : f32 to vector<16x1xf32>
    %53 = tpu.concatenate %51, %50, %52 in 1 : vector<16x1xf32>, vector<16x16xf32>, vector<16x1xf32> -> vector<16x18xf32>
    %c0_22 = arith.constant 0 : index
    %c0_23 = arith.constant 0 : index
    %54 = vector.load %arg7[%c0_22, %c0_23] : memref<16x48xbf16, #tpu.memory_space<vmem>>, vector<16x48xbf16>
    %c0_24 = arith.constant 0 : index
    %c0_25 = arith.constant 0 : index
    %55 = vector.load %arg6[%c0_24, %c0_25] : memref<16x1xf32, #tpu.memory_space<vmem>>, vector<16x1xf32>
    %56 = vector.extract_strided_slice %53 {offsets = [0, 0], sizes = [16, 16], strides = [1, 1]} : vector<16x18xf32> to vector<16x16xf32>
    %57 = vector.extract_strided_slice %53 {offsets = [0, 1], sizes = [16, 16], strides = [1, 1]} : vector<16x18xf32> to vector<16x16xf32>
    %58 = vector.extract_strided_slice %53 {offsets = [0, 2], sizes = [16, 16], strides = [1, 1]} : vector<16x18xf32> to vector<16x16xf32>
    %59 = tpu.concatenate %56, %57, %58 in 0 : vector<16x16xf32>, vector<16x16xf32>, vector<16x16xf32> -> vector<48x16xf32>
    %60 = arith.truncf %59 : vector<48x16xf32> to vector<48x16xbf16>
    %cst_26 = arith.constant dense<0.000000e+00> : vector<16x16xf32>
    %61 = tpu.matmul %54, %60, %cst_26 {dimension_numbers = #tpu.dot_dimension_numbers<[1], [0], [0], [1], [0, 0, 1, 1], [], []>} : vector<16x48xbf16>, vector<48x16xbf16>, vector<16x16xf32> -> vector<16x16xf32>
    %62 = vector.broadcast %55 : vector<16x1xf32> to vector<16x16xf32>
    %63 = arith.addf %61, %62 : vector<16x16xf32>
    %64 = arith.addf %63, %45 : vector<16x16xf32>
    %cst_27 = arith.constant 0.000000e+00 : f32
    %65 = vector.broadcast %cst_27 : f32 to vector<16x16xf32>
    %66 = arith.cmpf oge, %64, %65 : vector<16x16xf32>
    %cst_28 = arith.constant 1.000000e-01 : f32
    %67 = vector.broadcast %cst_28 : f32 to vector<16x16xf32>
    %68 = arith.mulf %67, %64 : vector<16x16xf32>
    %69 = arith.select %66, %64, %68 : vector<16x16xi1>, vector<16x16xf32>
    %cst_29 = arith.constant 0.000000e+00 : f32
    %70 = vector.broadcast %cst_29 : f32 to vector<16x3xf32>
    %cst_30 = arith.constant 0.000000e+00 : f32
    %71 = vector.broadcast %cst_30 : f32 to vector<16x3xf32>
    %72 = tpu.concatenate %70, %69, %71 in 1 : vector<16x3xf32>, vector<16x16xf32>, vector<16x3xf32> -> vector<16x22xf32>
    %c0_31 = arith.constant 0 : index
    %c0_32 = arith.constant 0 : index
    %73 = vector.load %arg9[%c0_31, %c0_32] : memref<16x48xbf16, #tpu.memory_space<vmem>>, vector<16x48xbf16>
    %c0_33 = arith.constant 0 : index
    %c0_34 = arith.constant 0 : index
    %74 = vector.load %arg8[%c0_33, %c0_34] : memref<16x1xf32, #tpu.memory_space<vmem>>, vector<16x1xf32>
    %75 = vector.extract_strided_slice %72 {offsets = [0, 0], sizes = [16, 16], strides = [1, 1]} : vector<16x22xf32> to vector<16x16xf32>
    %76 = vector.extract_strided_slice %72 {offsets = [0, 3], sizes = [16, 16], strides = [1, 1]} : vector<16x22xf32> to vector<16x16xf32>
    %77 = vector.extract_strided_slice %72 {offsets = [0, 6], sizes = [16, 16], strides = [1, 1]} : vector<16x22xf32> to vector<16x16xf32>
    %78 = tpu.concatenate %75, %76, %77 in 0 : vector<16x16xf32>, vector<16x16xf32>, vector<16x16xf32> -> vector<48x16xf32>
    %79 = arith.truncf %78 : vector<48x16xf32> to vector<48x16xbf16>
    %cst_35 = arith.constant dense<0.000000e+00> : vector<16x16xf32>
    %80 = tpu.matmul %73, %79, %cst_35 {dimension_numbers = #tpu.dot_dimension_numbers<[1], [0], [0], [1], [0, 0, 1, 1], [], []>} : vector<16x48xbf16>, vector<48x16xbf16>, vector<16x16xf32> -> vector<16x16xf32>
    %81 = vector.broadcast %74 : vector<16x1xf32> to vector<16x16xf32>
    %82 = arith.addf %80, %81 : vector<16x16xf32>
    %83 = arith.addf %82, %64 : vector<16x16xf32>
    %cst_36 = arith.constant 0.000000e+00 : f32
    %84 = vector.broadcast %cst_36 : f32 to vector<16x16xf32>
    %85 = arith.cmpf oge, %45, %84 : vector<16x16xf32>
    %cst_37 = arith.constant 1.000000e-01 : f32
    %86 = vector.broadcast %cst_37 : f32 to vector<16x16xf32>
    %87 = arith.mulf %86, %45 : vector<16x16xf32>
    %88 = arith.select %85, %45, %87 : vector<16x16xi1>, vector<16x16xf32>
    %cst_38 = arith.constant 0.000000e+00 : f32
    %89 = vector.broadcast %cst_38 : f32 to vector<16x2xf32>
    %cst_39 = arith.constant 0.000000e+00 : f32
    %90 = vector.broadcast %cst_39 : f32 to vector<16x2xf32>
    %91 = tpu.concatenate %89, %88, %90 in 1 : vector<16x2xf32>, vector<16x16xf32>, vector<16x2xf32> -> vector<16x20xf32>
    %c0_40 = arith.constant 0 : index
    %c0_41 = arith.constant 0 : index
    %92 = vector.load %arg11[%c0_40, %c0_41] : memref<16x80xbf16, #tpu.memory_space<vmem>>, vector<16x80xbf16>
    %c0_42 = arith.constant 0 : index
    %c0_43 = arith.constant 0 : index
    %93 = vector.load %arg10[%c0_42, %c0_43] : memref<16x1xf32, #tpu.memory_space<vmem>>, vector<16x1xf32>
    %94 = vector.extract_strided_slice %91 {offsets = [0, 0], sizes = [16, 16], strides = [1, 1]} : vector<16x20xf32> to vector<16x16xf32>
    %95 = vector.extract_strided_slice %91 {offsets = [0, 1], sizes = [16, 16], strides = [1, 1]} : vector<16x20xf32> to vector<16x16xf32>
    %96 = vector.extract_strided_slice %91 {offsets = [0, 2], sizes = [16, 16], strides = [1, 1]} : vector<16x20xf32> to vector<16x16xf32>
    %97 = vector.extract_strided_slice %91 {offsets = [0, 3], sizes = [16, 16], strides = [1, 1]} : vector<16x20xf32> to vector<16x16xf32>
    %98 = vector.extract_strided_slice %91 {offsets = [0, 4], sizes = [16, 16], strides = [1, 1]} : vector<16x20xf32> to vector<16x16xf32>
    %99 = tpu.concatenate %94, %95, %96, %97, %98 in 0 : vector<16x16xf32>, vector<16x16xf32>, vector<16x16xf32>, vector<16x16xf32>, vector<16x16xf32> -> vector<80x16xf32>
    %100 = arith.truncf %99 : vector<80x16xf32> to vector<80x16xbf16>
    %cst_44 = arith.constant dense<0.000000e+00> : vector<16x16xf32>
    %101 = tpu.matmul %92, %100, %cst_44 {dimension_numbers = #tpu.dot_dimension_numbers<[1], [0], [0], [1], [0, 0, 1, 1], [], []>} : vector<16x80xbf16>, vector<80x16xbf16>, vector<16x16xf32> -> vector<16x16xf32>
    %102 = vector.broadcast %93 : vector<16x1xf32> to vector<16x16xf32>
    %103 = arith.addf %101, %102 : vector<16x16xf32>
    %104 = arith.addf %103, %45 : vector<16x16xf32>
    %cst_45 = arith.constant 0.000000e+00 : f32
    %105 = vector.broadcast %cst_45 : f32 to vector<16x16xf32>
    %106 = arith.cmpf oge, %104, %105 : vector<16x16xf32>
    %cst_46 = arith.constant 1.000000e-01 : f32
    %107 = vector.broadcast %cst_46 : f32 to vector<16x16xf32>
    %108 = arith.mulf %107, %104 : vector<16x16xf32>
    %109 = arith.select %106, %104, %108 : vector<16x16xi1>, vector<16x16xf32>
    %cst_47 = arith.constant 0.000000e+00 : f32
    %110 = vector.broadcast %cst_47 : f32 to vector<16x6xf32>
    %cst_48 = arith.constant 0.000000e+00 : f32
    %111 = vector.broadcast %cst_48 : f32 to vector<16x6xf32>
    %112 = tpu.concatenate %110, %109, %111 in 1 : vector<16x6xf32>, vector<16x16xf32>, vector<16x6xf32> -> vector<16x28xf32>
    %c0_49 = arith.constant 0 : index
    %c0_50 = arith.constant 0 : index
    %113 = vector.load %arg13[%c0_49, %c0_50] : memref<16x80xbf16, #tpu.memory_space<vmem>>, vector<16x80xbf16>
    %c0_51 = arith.constant 0 : index
    %c0_52 = arith.constant 0 : index
    %114 = vector.load %arg12[%c0_51, %c0_52] : memref<16x1xf32, #tpu.memory_space<vmem>>, vector<16x1xf32>
    %115 = vector.extract_strided_slice %112 {offsets = [0, 0], sizes = [16, 16], strides = [1, 1]} : vector<16x28xf32> to vector<16x16xf32>
    %116 = vector.extract_strided_slice %112 {offsets = [0, 3], sizes = [16, 16], strides = [1, 1]} : vector<16x28xf32> to vector<16x16xf32>
    %117 = vector.extract_strided_slice %112 {offsets = [0, 6], sizes = [16, 16], strides = [1, 1]} : vector<16x28xf32> to vector<16x16xf32>
    %118 = vector.extract_strided_slice %112 {offsets = [0, 9], sizes = [16, 16], strides = [1, 1]} : vector<16x28xf32> to vector<16x16xf32>
    %119 = vector.extract_strided_slice %112 {offsets = [0, 12], sizes = [16, 16], strides = [1, 1]} : vector<16x28xf32> to vector<16x16xf32>
    %120 = tpu.concatenate %115, %116, %117, %118, %119 in 0 : vector<16x16xf32>, vector<16x16xf32>, vector<16x16xf32>, vector<16x16xf32>, vector<16x16xf32> -> vector<80x16xf32>
    %121 = arith.truncf %120 : vector<80x16xf32> to vector<80x16xbf16>
    %cst_53 = arith.constant dense<0.000000e+00> : vector<16x16xf32>
    %122 = tpu.matmul %113, %121, %cst_53 {dimension_numbers = #tpu.dot_dimension_numbers<[1], [0], [0], [1], [0, 0, 1, 1], [], []>} : vector<16x80xbf16>, vector<80x16xbf16>, vector<16x16xf32> -> vector<16x16xf32>
    %123 = vector.broadcast %114 : vector<16x1xf32> to vector<16x16xf32>
    %124 = arith.addf %122, %123 : vector<16x16xf32>
    %125 = arith.addf %124, %104 : vector<16x16xf32>
    %126 = arith.addf %83, %125 : vector<16x16xf32>
    %cst_54 = arith.constant 5.000000e-01 : f32
    %127 = vector.broadcast %cst_54 : f32 to vector<16x16xf32>
    %128 = arith.mulf %126, %127 : vector<16x16xf32>
    %cst_55 = arith.constant 0.000000e+00 : f32
    %129 = vector.broadcast %cst_55 : f32 to vector<16x16xf32>
    %130 = arith.cmpf oge, %128, %129 : vector<16x16xf32>
    %cst_56 = arith.constant 1.000000e-01 : f32
    %131 = vector.broadcast %cst_56 : f32 to vector<16x16xf32>
    %132 = arith.mulf %131, %128 : vector<16x16xf32>
    %133 = arith.select %130, %128, %132 : vector<16x16xi1>, vector<16x16xf32>
    %134 = tpu.iota {dimensions = array<i32: 0>} : vector<16x31xi32>
    %135 = tpu.iota {dimensions = array<i32: 1>} : vector<16x31xi32>
    %c2_i32_57 = arith.constant 2 : i32
    %136 = vector.broadcast %c2_i32_57 : i32 to vector<16x31xi32>
    %137 = arith.muli %134, %136 : vector<16x31xi32>
    %138 = arith.cmpi eq, %135, %137 : vector<16x31xi32>
    %139 = arith.extui %138 : vector<16x31xi1> to vector<16x31xi32>
    %140 = arith.sitofp %139 : vector<16x31xi32> to vector<16x31xf32>
    %cst_58 = arith.constant dense<0.000000e+00> : vector<16x31xf32>
    %141 = tpu.matmul %133, %140, %cst_58 {dimension_numbers = #tpu.dot_dimension_numbers<[1], [0], [0], [1], [0, 0, 1, 1], [], []>} : vector<16x16xf32>, vector<16x31xf32>, vector<16x31xf32> -> vector<16x31xf32>
    %cst_59 = arith.constant 0.000000e+00 : f32
    %142 = vector.broadcast %cst_59 : f32 to vector<16x2xf32>
    %cst_60 = arith.constant 0.000000e+00 : f32
    %143 = vector.broadcast %cst_60 : f32 to vector<16x2xf32>
    %144 = tpu.concatenate %142, %141, %143 in 1 : vector<16x2xf32>, vector<16x31xf32>, vector<16x2xf32> -> vector<16x35xf32>
    %c0_61 = arith.constant 0 : index
    %c0_62 = arith.constant 0 : index
    %145 = vector.load %arg25[%c0_61, %c0_62] : memref<8x64xbf16, #tpu.memory_space<vmem>>, vector<8x64xbf16>
    %c0_63 = arith.constant 0 : index
    %c0_64 = arith.constant 0 : index
    %146 = vector.load %arg24[%c0_63, %c0_64] : memref<8x1xf32, #tpu.memory_space<vmem>>, vector<8x1xf32>
    %147 = vector.extract_strided_slice %144 {offsets = [0, 0], sizes = [16, 32], strides = [1, 1]} : vector<16x35xf32> to vector<16x32xf32>
    %148 = vector.extract_strided_slice %144 {offsets = [0, 1], sizes = [16, 32], strides = [1, 1]} : vector<16x35xf32> to vector<16x32xf32>
    %149 = vector.extract_strided_slice %144 {offsets = [0, 2], sizes = [16, 32], strides = [1, 1]} : vector<16x35xf32> to vector<16x32xf32>
    %150 = vector.extract_strided_slice %144 {offsets = [0, 3], sizes = [16, 32], strides = [1, 1]} : vector<16x35xf32> to vector<16x32xf32>
    %151 = tpu.concatenate %147, %148, %149, %150 in 0 : vector<16x32xf32>, vector<16x32xf32>, vector<16x32xf32>, vector<16x32xf32> -> vector<64x32xf32>
    %152 = arith.truncf %151 : vector<64x32xf32> to vector<64x32xbf16>
    %cst_65 = arith.constant dense<0.000000e+00> : vector<8x32xf32>
    %153 = tpu.matmul %145, %152, %cst_65 {dimension_numbers = #tpu.dot_dimension_numbers<[1], [0], [0], [1], [0, 0, 1, 1], [], []>} : vector<8x64xbf16>, vector<64x32xbf16>, vector<8x32xf32> -> vector<8x32xf32>
    %154 = vector.broadcast %146 : vector<8x1xf32> to vector<8x32xf32>
    %155 = arith.addf %153, %154 : vector<8x32xf32>
    %cst_66 = arith.constant 0.000000e+00 : f32
    %156 = vector.broadcast %cst_66 : f32 to vector<8x32xf32>
    %157 = arith.cmpf oge, %155, %156 : vector<8x32xf32>
    %cst_67 = arith.constant 1.000000e-01 : f32
    %158 = vector.broadcast %cst_67 : f32 to vector<8x32xf32>
    %159 = arith.mulf %158, %155 : vector<8x32xf32>
    %160 = arith.select %157, %155, %159 : vector<8x32xi1>, vector<8x32xf32>
    %cst_68 = arith.constant 0.000000e+00 : f32
    %161 = vector.broadcast %cst_68 : f32 to vector<8x1xf32>
    %cst_69 = arith.constant 0.000000e+00 : f32
    %162 = vector.broadcast %cst_69 : f32 to vector<8x1xf32>
    %163 = tpu.concatenate %161, %160, %162 in 1 : vector<8x1xf32>, vector<8x32xf32>, vector<8x1xf32> -> vector<8x34xf32>
    %c0_70 = arith.constant 0 : index
    %c0_71 = arith.constant 0 : index
    %164 = vector.load %arg15[%c0_70, %c0_71] : memref<8x24xbf16, #tpu.memory_space<vmem>>, vector<8x24xbf16>
    %c0_72 = arith.constant 0 : index
    %c0_73 = arith.constant 0 : index
    %165 = vector.load %arg14[%c0_72, %c0_73] : memref<8x1xf32, #tpu.memory_space<vmem>>, vector<8x1xf32>
    %166 = vector.extract_strided_slice %163 {offsets = [0, 0], sizes = [8, 32], strides = [1, 1]} : vector<8x34xf32> to vector<8x32xf32>
    %167 = vector.extract_strided_slice %163 {offsets = [0, 1], sizes = [8, 32], strides = [1, 1]} : vector<8x34xf32> to vector<8x32xf32>
    %168 = vector.extract_strided_slice %163 {offsets = [0, 2], sizes = [8, 32], strides = [1, 1]} : vector<8x34xf32> to vector<8x32xf32>
    %169 = tpu.concatenate %166, %167, %168 in 0 : vector<8x32xf32>, vector<8x32xf32>, vector<8x32xf32> -> vector<24x32xf32>
    %170 = arith.truncf %169 : vector<24x32xf32> to vector<24x32xbf16>
    %cst_74 = arith.constant dense<0.000000e+00> : vector<8x32xf32>
    %171 = tpu.matmul %164, %170, %cst_74 {dimension_numbers = #tpu.dot_dimension_numbers<[1], [0], [0], [1], [0, 0, 1, 1], [], []>} : vector<8x24xbf16>, vector<24x32xbf16>, vector<8x32xf32> -> vector<8x32xf32>
    %172 = vector.broadcast %165 : vector<8x1xf32> to vector<8x32xf32>
    %173 = arith.addf %171, %172 : vector<8x32xf32>
    %174 = arith.addf %173, %155 : vector<8x32xf32>
    %cst_75 = arith.constant 0.000000e+00 : f32
    %175 = vector.broadcast %cst_75 : f32 to vector<8x32xf32>
    %176 = arith.cmpf oge, %174, %175 : vector<8x32xf32>
    %cst_76 = arith.constant 1.000000e-01 : f32
    %177 = vector.broadcast %cst_76 : f32 to vector<8x32xf32>
    %178 = arith.mulf %177, %174 : vector<8x32xf32>
    %179 = arith.select %176, %174, %178 : vector<8x32xi1>, vector<8x32xf32>
    %cst_77 = arith.constant 0.000000e+00 : f32
    %180 = vector.broadcast %cst_77 : f32 to vector<8x3xf32>
    %cst_78 = arith.constant 0.000000e+00 : f32
    %181 = vector.broadcast %cst_78 : f32 to vector<8x3xf32>
    %182 = tpu.concatenate %180, %179, %181 in 1 : vector<8x3xf32>, vector<8x32xf32>, vector<8x3xf32> -> vector<8x38xf32>
    %c0_79 = arith.constant 0 : index
    %c0_80 = arith.constant 0 : index
    %183 = vector.load %arg17[%c0_79, %c0_80] : memref<8x24xbf16, #tpu.memory_space<vmem>>, vector<8x24xbf16>
    %c0_81 = arith.constant 0 : index
    %c0_82 = arith.constant 0 : index
    %184 = vector.load %arg16[%c0_81, %c0_82] : memref<8x1xf32, #tpu.memory_space<vmem>>, vector<8x1xf32>
    %185 = vector.extract_strided_slice %182 {offsets = [0, 0], sizes = [8, 32], strides = [1, 1]} : vector<8x38xf32> to vector<8x32xf32>
    %186 = vector.extract_strided_slice %182 {offsets = [0, 3], sizes = [8, 32], strides = [1, 1]} : vector<8x38xf32> to vector<8x32xf32>
    %187 = vector.extract_strided_slice %182 {offsets = [0, 6], sizes = [8, 32], strides = [1, 1]} : vector<8x38xf32> to vector<8x32xf32>
    %188 = tpu.concatenate %185, %186, %187 in 0 : vector<8x32xf32>, vector<8x32xf32>, vector<8x32xf32> -> vector<24x32xf32>
    %189 = arith.truncf %188 : vector<24x32xf32> to vector<24x32xbf16>
    %cst_83 = arith.constant dense<0.000000e+00> : vector<8x32xf32>
    %190 = tpu.matmul %183, %189, %cst_83 {dimension_numbers = #tpu.dot_dimension_numbers<[1], [0], [0], [1], [0, 0, 1, 1], [], []>} : vector<8x24xbf16>, vector<24x32xbf16>, vector<8x32xf32> -> vector<8x32xf32>
    %191 = vector.broadcast %184 : vector<8x1xf32> to vector<8x32xf32>
    %192 = arith.addf %190, %191 : vector<8x32xf32>
    %193 = arith.addf %192, %174 : vector<8x32xf32>
    %cst_84 = arith.constant 0.000000e+00 : f32
    %194 = vector.broadcast %cst_84 : f32 to vector<8x32xf32>
    %195 = arith.cmpf oge, %155, %194 : vector<8x32xf32>
    %cst_85 = arith.constant 1.000000e-01 : f32
    %196 = vector.broadcast %cst_85 : f32 to vector<8x32xf32>
    %197 = arith.mulf %196, %155 : vector<8x32xf32>
    %198 = arith.select %195, %155, %197 : vector<8x32xi1>, vector<8x32xf32>
    %cst_86 = arith.constant 0.000000e+00 : f32
    %199 = vector.broadcast %cst_86 : f32 to vector<8x2xf32>
    %cst_87 = arith.constant 0.000000e+00 : f32
    %200 = vector.broadcast %cst_87 : f32 to vector<8x2xf32>
    %201 = tpu.concatenate %199, %198, %200 in 1 : vector<8x2xf32>, vector<8x32xf32>, vector<8x2xf32> -> vector<8x36xf32>
    %c0_88 = arith.constant 0 : index
    %c0_89 = arith.constant 0 : index
    %202 = vector.load %arg19[%c0_88, %c0_89] : memref<8x40xbf16, #tpu.memory_space<vmem>>, vector<8x40xbf16>
    %c0_90 = arith.constant 0 : index
    %c0_91 = arith.constant 0 : index
    %203 = vector.load %arg18[%c0_90, %c0_91] : memref<8x1xf32, #tpu.memory_space<vmem>>, vector<8x1xf32>
    %204 = vector.extract_strided_slice %201 {offsets = [0, 0], sizes = [8, 32], strides = [1, 1]} : vector<8x36xf32> to vector<8x32xf32>
    %205 = vector.extract_strided_slice %201 {offsets = [0, 1], sizes = [8, 32], strides = [1, 1]} : vector<8x36xf32> to vector<8x32xf32>
    %206 = vector.extract_strided_slice %201 {offsets = [0, 2], sizes = [8, 32], strides = [1, 1]} : vector<8x36xf32> to vector<8x32xf32>
    %207 = vector.extract_strided_slice %201 {offsets = [0, 3], sizes = [8, 32], strides = [1, 1]} : vector<8x36xf32> to vector<8x32xf32>
    %208 = vector.extract_strided_slice %201 {offsets = [0, 4], sizes = [8, 32], strides = [1, 1]} : vector<8x36xf32> to vector<8x32xf32>
    %209 = tpu.concatenate %204, %205, %206, %207, %208 in 0 : vector<8x32xf32>, vector<8x32xf32>, vector<8x32xf32>, vector<8x32xf32>, vector<8x32xf32> -> vector<40x32xf32>
    %210 = arith.truncf %209 : vector<40x32xf32> to vector<40x32xbf16>
    %cst_92 = arith.constant dense<0.000000e+00> : vector<8x32xf32>
    %211 = tpu.matmul %202, %210, %cst_92 {dimension_numbers = #tpu.dot_dimension_numbers<[1], [0], [0], [1], [0, 0, 1, 1], [], []>} : vector<8x40xbf16>, vector<40x32xbf16>, vector<8x32xf32> -> vector<8x32xf32>
    %212 = vector.broadcast %203 : vector<8x1xf32> to vector<8x32xf32>
    %213 = arith.addf %211, %212 : vector<8x32xf32>
    %214 = arith.addf %213, %155 : vector<8x32xf32>
    %cst_93 = arith.constant 0.000000e+00 : f32
    %215 = vector.broadcast %cst_93 : f32 to vector<8x32xf32>
    %216 = arith.cmpf oge, %214, %215 : vector<8x32xf32>
    %cst_94 = arith.constant 1.000000e-01 : f32
    %217 = vector.broadcast %cst_94 : f32 to vector<8x32xf32>
    %218 = arith.mulf %217, %214 : vector<8x32xf32>
    %219 = arith.select %216, %214, %218 : vector<8x32xi1>, vector<8x32xf32>
    %cst_95 = arith.constant 0.000000e+00 : f32
    %220 = vector.broadcast %cst_95 : f32 to vector<8x6xf32>
    %cst_96 = arith.constant 0.000000e+00 : f32
    %221 = vector.broadcast %cst_96 : f32 to vector<8x6xf32>
    %222 = tpu.concatenate %220, %219, %221 in 1 : vector<8x6xf32>, vector<8x32xf32>, vector<8x6xf32> -> vector<8x44xf32>
    %c0_97 = arith.constant 0 : index
    %c0_98 = arith.constant 0 : index
    %223 = vector.load %arg21[%c0_97, %c0_98] : memref<8x40xbf16, #tpu.memory_space<vmem>>, vector<8x40xbf16>
    %c0_99 = arith.constant 0 : index
    %c0_100 = arith.constant 0 : index
    %224 = vector.load %arg20[%c0_99, %c0_100] : memref<8x1xf32, #tpu.memory_space<vmem>>, vector<8x1xf32>
    %225 = vector.extract_strided_slice %222 {offsets = [0, 0], sizes = [8, 32], strides = [1, 1]} : vector<8x44xf32> to vector<8x32xf32>
    %226 = vector.extract_strided_slice %222 {offsets = [0, 3], sizes = [8, 32], strides = [1, 1]} : vector<8x44xf32> to vector<8x32xf32>
    %227 = vector.extract_strided_slice %222 {offsets = [0, 6], sizes = [8, 32], strides = [1, 1]} : vector<8x44xf32> to vector<8x32xf32>
    %228 = vector.extract_strided_slice %222 {offsets = [0, 9], sizes = [8, 32], strides = [1, 1]} : vector<8x44xf32> to vector<8x32xf32>
    %229 = vector.extract_strided_slice %222 {offsets = [0, 12], sizes = [8, 32], strides = [1, 1]} : vector<8x44xf32> to vector<8x32xf32>
    %230 = tpu.concatenate %225, %226, %227, %228, %229 in 0 : vector<8x32xf32>, vector<8x32xf32>, vector<8x32xf32>, vector<8x32xf32>, vector<8x32xf32> -> vector<40x32xf32>
    %231 = arith.truncf %230 : vector<40x32xf32> to vector<40x32xbf16>
    %cst_101 = arith.constant dense<0.000000e+00> : vector<8x32xf32>
    %232 = tpu.matmul %223, %231, %cst_101 {dimension_numbers = #tpu.dot_dimension_numbers<[1], [0], [0], [1], [0, 0, 1, 1], [], []>} : vector<8x40xbf16>, vector<40x32xbf16>, vector<8x32xf32> -> vector<8x32xf32>
    %233 = vector.broadcast %224 : vector<8x1xf32> to vector<8x32xf32>
    %234 = arith.addf %232, %233 : vector<8x32xf32>
    %235 = arith.addf %234, %214 : vector<8x32xf32>
    %236 = arith.addf %193, %235 : vector<8x32xf32>
    %cst_102 = arith.constant 5.000000e-01 : f32
    %237 = vector.broadcast %cst_102 : f32 to vector<8x32xf32>
    %238 = arith.mulf %236, %237 : vector<8x32xf32>
    %cst_103 = arith.constant 0.000000e+00 : f32
    %239 = vector.broadcast %cst_103 : f32 to vector<8x32xf32>
    %240 = arith.cmpf oge, %238, %239 : vector<8x32xf32>
    %cst_104 = arith.constant 0.00999999977 : f32
    %241 = vector.broadcast %cst_104 : f32 to vector<8x32xf32>
    %242 = arith.mulf %241, %238 : vector<8x32xf32>
    %243 = arith.select %240, %238, %242 : vector<8x32xi1>, vector<8x32xf32>
    %244 = vector.extract_strided_slice %243 {offsets = [0, 1], sizes = [8, 1], strides = [1, 1]} : vector<8x32xf32> to vector<8x1xf32>
    %245 = tpu.concatenate %244, %243 in 1 : vector<8x1xf32>, vector<8x32xf32> -> vector<8x33xf32>
    %cst_105 = arith.constant 0.000000e+00 : f32
    %246 = vector.broadcast %cst_105 : f32 to vector<8x3xf32>
    %cst_106 = arith.constant 0.000000e+00 : f32
    %247 = vector.broadcast %cst_106 : f32 to vector<8x3xf32>
    %248 = tpu.concatenate %246, %245, %247 in 1 : vector<8x3xf32>, vector<8x33xf32>, vector<8x3xf32> -> vector<8x39xf32>
    %c0_107 = arith.constant 0 : index
    %c0_108 = arith.constant 0 : index
    %249 = vector.load %arg3[%c0_107, %c0_108] : memref<9x56xbf16, #tpu.memory_space<vmem>>, vector<9x56xbf16>
    %c0_109 = arith.constant 0 : index
    %c0_110 = arith.constant 0 : index
    %250 = vector.load %arg2[%c0_109, %c0_110] : memref<9x1xf32, #tpu.memory_space<vmem>>, vector<9x1xf32>
    %251 = vector.extract_strided_slice %248 {offsets = [0, 0], sizes = [8, 33], strides = [1, 1]} : vector<8x39xf32> to vector<8x33xf32>
    %252 = vector.extract_strided_slice %248 {offsets = [0, 1], sizes = [8, 33], strides = [1, 1]} : vector<8x39xf32> to vector<8x33xf32>
    %253 = vector.extract_strided_slice %248 {offsets = [0, 2], sizes = [8, 33], strides = [1, 1]} : vector<8x39xf32> to vector<8x33xf32>
    %254 = vector.extract_strided_slice %248 {offsets = [0, 3], sizes = [8, 33], strides = [1, 1]} : vector<8x39xf32> to vector<8x33xf32>
    %255 = vector.extract_strided_slice %248 {offsets = [0, 4], sizes = [8, 33], strides = [1, 1]} : vector<8x39xf32> to vector<8x33xf32>
    %256 = vector.extract_strided_slice %248 {offsets = [0, 5], sizes = [8, 33], strides = [1, 1]} : vector<8x39xf32> to vector<8x33xf32>
    %257 = vector.extract_strided_slice %248 {offsets = [0, 6], sizes = [8, 33], strides = [1, 1]} : vector<8x39xf32> to vector<8x33xf32>
    %258 = tpu.concatenate %251, %252, %253, %254, %255, %256, %257 in 0 : vector<8x33xf32>, vector<8x33xf32>, vector<8x33xf32>, vector<8x33xf32>, vector<8x33xf32>, vector<8x33xf32>, vector<8x33xf32> -> vector<56x33xf32>
    %259 = arith.truncf %258 : vector<56x33xf32> to vector<56x33xbf16>
    %cst_111 = arith.constant dense<0.000000e+00> : vector<9x33xf32>
    %260 = tpu.matmul %249, %259, %cst_111 {dimension_numbers = #tpu.dot_dimension_numbers<[1], [0], [0], [1], [0, 0, 1, 1], [], []>} : vector<9x56xbf16>, vector<56x33xbf16>, vector<9x33xf32> -> vector<9x33xf32>
    %261 = vector.broadcast %250 : vector<9x1xf32> to vector<9x33xf32>
    %262 = arith.addf %260, %261 : vector<9x33xf32>
    %263 = math.sin %262 : vector<9x33xf32>
    %c0_112 = arith.constant 0 : index
    %c0_113 = arith.constant 0 : index
    %c0_114 = arith.constant 0 : index
    %264 = vector.load %arg26[%c0_112, %c0_113, %c0_114] : memref<1x9x33xf32, #tpu.memory_space<vmem>>, vector<1x9x33xf32>
    %265 = vector.shape_cast %264 : vector<1x9x33xf32> to vector<9x33xf32>
    %266 = vector.shape_cast %263 : vector<9x33xf32> to vector<1x9x33xf32>
    tpu.vector_store %arg26[%c0_112, %c0_113, %c0_114], %266 {strides = array<i32>} : memref<1x9x33xf32, #tpu.memory_space<vmem>>, vector<1x9x33xf32>,
    return
  }
  func.func @transform_0(%arg0: i32) -> (i32, i32, i32) {
    %c0_i32 = arith.constant 0 : i32
    %c0_i32_0 = arith.constant 0 : i32
    %c0_i32_1 = arith.constant 0 : i32
    return %arg0, %c0_i32, %c0_i32_0 : i32, i32, i32
  }
  func.func @transform_1(%arg0: i32) -> (i32, i32) {
    %c0_i32 = arith.constant 0 : i32
    %c0_i32_0 = arith.constant 0 : i32
    %c0_i32_1 = arith.constant 0 : i32
    return %c0_i32, %c0_i32_0 : i32, i32
  }
  func.func @transform_2(%arg0: i32) -> (i32, i32) {
    %c0_i32 = arith.constant 0 : i32
    %c0_i32_0 = arith.constant 0 : i32
    %c0_i32_1 = arith.constant 0 : i32
    return %c0_i32, %c0_i32_0 : i32, i32
  }
  func.func @transform_3(%arg0: i32) -> (i32, i32) {
    %c0_i32 = arith.constant 0 : i32
    %c0_i32_0 = arith.constant 0 : i32
    %c0_i32_1 = arith.constant 0 : i32
    return %c0_i32, %c0_i32_0 : i32, i32
  }
  func.func @transform_4(%arg0: i32) -> (i32, i32) {
    %c0_i32 = arith.constant 0 : i32
    %c0_i32_0 = arith.constant 0 : i32
    %c0_i32_1 = arith.constant 0 : i32
    return %c0_i32, %c0_i32_0 : i32, i32
  }
  func.func @transform_5(%arg0: i32) -> (i32, i32) {
    %c0_i32 = arith.constant 0 : i32
    %c0_i32_0 = arith.constant 0 : i32
    %c0_i32_1 = arith.constant 0 : i32
    return %c0_i32, %c0_i32_0 : i32, i32
  }
  func.func @transform_6(%arg0: i32) -> (i32, i32) {
    %c0_i32 = arith.constant 0 : i32
    %c0_i32_0 = arith.constant 0 : i32
    %c0_i32_1 = arith.constant 0 : i32
    return %c0_i32, %c0_i32_0 : i32, i32
  }
  func.func @transform_7(%arg0: i32) -> (i32, i32) {
    %c0_i32 = arith.constant 0 : i32
    %c0_i32_0 = arith.constant 0 : i32
    %c0_i32_1 = arith.constant 0 : i32
    return %c0_i32, %c0_i32_0 : i32, i32
  }
  func.func @transform_8(%arg0: i32) -> (i32, i32) {
    %c0_i32 = arith.constant 0 : i32
    %c0_i32_0 = arith.constant 0 : i32
    %c0_i32_1 = arith.constant 0 : i32
    return %c0_i32, %c0_i32_0 : i32, i32
  }
  func.func @transform_9(%arg0: i32) -> (i32, i32) {
    %c0_i32 = arith.constant 0 : i32
    %c0_i32_0 = arith.constant 0 : i32
    %c0_i32_1 = arith.constant 0 : i32
    return %c0_i32, %c0_i32_0 : i32, i32
  }
  func.func @transform_10(%arg0: i32) -> (i32, i32) {
    %c0_i32 = arith.constant 0 : i32
    %c0_i32_0 = arith.constant 0 : i32
    %c0_i32_1 = arith.constant 0 : i32
    return %c0_i32, %c0_i32_0 : i32, i32
  }
  func.func @transform_11(%arg0: i32) -> (i32, i32) {
    %c0_i32 = arith.constant 0 : i32
    %c0_i32_0 = arith.constant 0 : i32
    %c0_i32_1 = arith.constant 0 : i32
    return %c0_i32, %c0_i32_0 : i32, i32
  }
  func.func @transform_12(%arg0: i32) -> (i32, i32) {
    %c0_i32 = arith.constant 0 : i32
    %c0_i32_0 = arith.constant 0 : i32
    %c0_i32_1 = arith.constant 0 : i32
    return %c0_i32, %c0_i32_0 : i32, i32
  }
  func.func @transform_13(%arg0: i32) -> (i32, i32) {
    %c0_i32 = arith.constant 0 : i32
    %c0_i32_0 = arith.constant 0 : i32
    %c0_i32_1 = arith.constant 0 : i32
    return %c0_i32, %c0_i32_0 : i32, i32
  }
  func.func @transform_14(%arg0: i32) -> (i32, i32) {
    %c0_i32 = arith.constant 0 : i32
    %c0_i32_0 = arith.constant 0 : i32
    %c0_i32_1 = arith.constant 0 : i32
    return %c0_i32, %c0_i32_0 : i32, i32
  }
  func.func @transform_15(%arg0: i32) -> (i32, i32) {
    %c0_i32 = arith.constant 0 : i32
    %c0_i32_0 = arith.constant 0 : i32
    %c0_i32_1 = arith.constant 0 : i32
    return %c0_i32, %c0_i32_0 : i32, i32
  }
  func.func @transform_16(%arg0: i32) -> (i32, i32) {
    %c0_i32 = arith.constant 0 : i32
    %c0_i32_0 = arith.constant 0 : i32
    %c0_i32_1 = arith.constant 0 : i32
    return %c0_i32, %c0_i32_0 : i32, i32
  }
  func.func @transform_17(%arg0: i32) -> (i32, i32) {
    %c0_i32 = arith.constant 0 : i32
    %c0_i32_0 = arith.constant 0 : i32
    %c0_i32_1 = arith.constant 0 : i32
    return %c0_i32, %c0_i32_0 : i32, i32
  }
  func.func @transform_18(%arg0: i32) -> (i32, i32) {
    %c0_i32 = arith.constant 0 : i32
    %c0_i32_0 = arith.constant 0 : i32
    %c0_i32_1 = arith.constant 0 : i32
    return %c0_i32, %c0_i32_0 : i32, i32
  }
  func.func @transform_19(%arg0: i32) -> (i32, i32) {
    %c0_i32 = arith.constant 0 : i32
    %c0_i32_0 = arith.constant 0 : i32
    %c0_i32_1 = arith.constant 0 : i32
    return %c0_i32, %c0_i32_0 : i32, i32
  }
  func.func @transform_20(%arg0: i32) -> (i32, i32) {
    %c0_i32 = arith.constant 0 : i32
    %c0_i32_0 = arith.constant 0 : i32
    %c0_i32_1 = arith.constant 0 : i32
    return %c0_i32, %c0_i32_0 : i32, i32
  }
  func.func @transform_21(%arg0: i32) -> (i32, i32) {
    %c0_i32 = arith.constant 0 : i32
    %c0_i32_0 = arith.constant 0 : i32
    %c0_i32_1 = arith.constant 0 : i32
    return %c0_i32, %c0_i32_0 : i32, i32
  }
  func.func @transform_22(%arg0: i32) -> (i32, i32) {
    %c0_i32 = arith.constant 0 : i32
    %c0_i32_0 = arith.constant 0 : i32
    %c0_i32_1 = arith.constant 0 : i32
    return %c0_i32, %c0_i32_0 : i32, i32
  }
  func.func @transform_23(%arg0: i32) -> (i32, i32) {
    %c0_i32 = arith.constant 0 : i32
    %c0_i32_0 = arith.constant 0 : i32
    %c0_i32_1 = arith.constant 0 : i32
    return %c0_i32, %c0_i32_0 : i32, i32
  }
  func.func @transform_24(%arg0: i32) -> (i32, i32) {
    %c0_i32 = arith.constant 0 : i32
    %c0_i32_0 = arith.constant 0 : i32
    %c0_i32_1 = arith.constant 0 : i32
    return %c0_i32, %c0_i32_0 : i32, i32
  }
  func.func @transform_25(%arg0: i32) -> (i32, i32, i32) {
    %c0_i32 = arith.constant 0 : i32
    %c0_i32_0 = arith.constant 0 : i32
    %c0_i32_1 = arith.constant 0 : i32
    return %arg0, %c0_i32, %c0_i32_0 : i32, i32, i32
  }
}

</mosaic_0001>

<bundles_post_ra>
// kernel: _lambda_.1
= control target key start
LH: loop header
LB: loop body
LE: loop exit
PB: predicated region body
PF: predicated region fallthrough
CT: control target
= control target key end

     0   :  { %s3804_s29 = smov 0   ;;  %s4427_s0 = inlined_call_operand.vmem [shape: f32[2,80,8], index: 0, kind: input, shape index: {}]   ;;  %s4428_s1 = inlined_call_operand.vmem [shape: f32[9,1], index: 1, kind: input, shape index: {}]   ;;  %s4429_s2 = inlined_call_operand.vmem [shape: bf16[9,56], index: 2, kind: input, shape index: {}]   ;;  %s4430_s3 = inlined_call_operand.vmem [shape: f32[32,1], index: 3, kind: input, shape index: {}]   ;;  %s4431_s4 = inlined_call_operand.vmem [shape: bf16[32,560], index: 4, kind: input, shape index: {}]   ;;  %s4432_s5 = inlined_call_operand.vmem [shape: f32[16,1], index: 5, kind: input, shape index: {}]   ;;  %s4433_s6 = inlined_call_operand.vmem [shape: bf16[16,48], index: 6, kind: input, shape index: {}]   ;;  %s4434_s7 = inlined_call_operand.vmem [shape: f32[16,1], index: 7, kind: input, shape index: {}]   ;;  %s4435_s8 = inlined_call_operand.vmem [shape: bf16[16,48], index: 8, kind: input, shape index: {}]   ;;  %s4436_s9 = inlined_call_operand.vmem [shape: f32[16,1], index: 9, kind: input, shape index: {}]   ;;  %s4437_s10 = inlined_call_operand.vmem [shape: bf16[16,80], index: 10, kind: input, shape index: {}]   ;;  %s4438_s11 = inlined_call_operand.vmem [shape: f32[16,1], index: 11, kind: input, shape index: {}]   ;;  %s4439_s12 = inlined_call_operand.vmem [shape: bf16[16,80], index: 12, kind: input, shape index: {}]   ;;  %s4440_s13 = inlined_call_operand.vmem [shape: f32[8,1], index: 13, kind: input, shape index: {}]   ;;  %s4441_s14 = inlined_call_operand.vmem [shape: bf16[8,24], index: 14, kind: input, shape index: {}]   ;;  %s4442_s15 = inlined_call_operand.vmem [shape: f32[8,1], index: 15, kind: input, shape index: {}]   ;;  %s4443_s16 = inlined_call_operand.vmem [shape: bf16[8,24], index: 16, kind: input, shape index: {}]   ;;  %s4444_s17 = inlined_call_operand.vmem [shape: f32[8,1], index: 17, kind: input, shape index: {}]   ;;  %s4445_s18 = inlined_call_operand.vmem [shape: bf16[8,40], index: 18, kind: input, shape index: {}]   ;;  %s4446_s19 = inlined_call_operand.vmem [shape: f32[8,1], index: 19, kind: input, shape index: {}]   ;;  %s4447_s20 = inlined_call_operand.vmem [shape: bf16[8,40], index: 20, kind: input, shape index: {}]   ;;  %s4448_s21 = inlined_call_operand.vmem [shape: f32[16,1], index: 21, kind: input, shape index: {}]   ;;  %s4449_s22 = inlined_call_operand.vmem [shape: bf16[16,128], index: 22, kind: input, shape index: {}]   ;;  %s4450_s23 = inlined_call_operand.vmem [shape: f32[8,1], index: 23, kind: input, shape index: {}]   ;;  %s4451_s24 = inlined_call_operand.vmem [shape: bf16[8,64], index: 24, kind: input, shape index: {}]   ;;  %s4452_s25 = inlined_call_operand.vmem [shape: f32[2,9,33], index: 25, kind: output, shape index: {}]  }
   0x1   :  { %4480 = sst [smem:[#allocation2_spill]] %s4427_s0 }
   0x2   :  { %4481 = sst [smem:[#allocation3_spill]] %s4428_s1 }
   0x3   :  { %4482 = sst [smem:[#allocation4_spill]] %s4429_s2 }
   0x4   :  { %4483 = sst [smem:[#allocation5_spill]] %s4430_s3 }
   0x5   :  { %4484 = sst [smem:[#allocation6_spill]] %s4431_s4 }
   0x6   :  { %4485 = sst [smem:[#allocation7_spill]] %s4432_s5 }
   0x7   :  { %4486 = sst [smem:[#allocation8_spill]] %s4433_s6 }
   0x8   :  { %4487 = sst [smem:[#allocation9_spill]] %s4434_s7 }
   0x9   :  { %4488 = sst [smem:[#allocation10_spill]] %s4435_s8 }
   0xa   :  { %4489 = sst [smem:[#allocation11_spill]] %s4436_s9 }
   0xb   :  { %4490 = sst [smem:[#allocation12_spill]] %s4437_s10 }
   0xc   :  { %4491 = sst [smem:[#allocation13_spill]] %s4448_s21 }
   0xd LB: > { %s2847_s2 = sadd.s32 4294967295, %s3648_s29   ;;  %p2851_p0 = scmp.ge.s32.totalorder %s3648_s29, 1  ;;  %s3648_s29 = sphi %s3804_s29, %s35_s29  }
   0xe   : > { %p687_p1 = scmp.lt.s32.totalorder %s3648_s29, 3 }
  0x10   : > { %p688_p2 = pnand %p2851_p0, %p687_p1 }
  0x11   : > { %p755_p3 = scmp.lt.s32.totalorder (!%p688_p2), %s2847_s2, 1  ;;  %s4492_s3 = sld [smem:[#allocation2_spill]] (!%p688_p2)  ;;  %vm816_vm0 = vcmask (!%p688_p2), 23552   ;;  %vm827_vm1 = vcmask (!%p688_p2), 89088   ;;  %v3657_v63 = vmov (!%p688_p2), 0   ;;  %vm1149_vm3 = vcmask (!%p688_p2), 392192  }
  0x12   : > { %691 = sbr.rel (%p688_p2) target bundleno = 4978 (0x1372), region = 120  ;;  %s4460_s1 = smov (!%p688_p2), 3   ;;  %3473 = vset.pattern.permute.xlu0 (!%p688_p2), %v3657_v63  ;;  %3472 = vset.pattern.permute.xlu1 (!%p688_p2), %v3657_v63  ;;  %vm3941_vm2 = vmpackc.low (!%p688_p2), %vm827_vm1, %vm827_vm1  ;;  %vm1323_vm6 = vcmask (!%p688_p2), 64512   ;;  %vm1437_vm10 = vcmask (!%p688_p2), 15360   ;;  %vm1442_vm11 = vcmask (!%p688_p2), 138240   ;;  %vm3661_vm13 = vmmov (!%p688_p2), 0  }
  0x13   : > { %s4471_s8 = smov (!%p688_p2), 127   ;;  %s4474_s27 = smov (!%p688_p2), 126   ;;  %vm4019_vm12 = vmpackc.low (!%p688_p2), %vm1442_vm11, %vm1442_vm11 }
  0x14   : > { %s4462_s4 = smov (!%p688_p2), 124   ;;  %s4464_s28 = smov (!%p688_p2), 125  }
  0x15   : > { %s4459_s9 = smov (!%p688_p2), 123   ;;  %s4477_s30 = smov (!%p688_p2), 122  }
  0x16   : > { %s4494_s0 = sld [smem:[#allocation5_spill]] (!%p688_p2)  ;;  %s4503_s5 = sld [smem:[#allocation7_spill]] (!%p688_p2) }
  0x17   : > { %s4502_s21 = sld [smem:[#allocation13_spill]] (!%p688_p2)  ;;  %s4504_s7 = sld [smem:[#allocation8_spill]] (!%p688_p2) }
  0x18   : > { %s4509_s10 = sld [smem:[#allocation12_spill]] (!%p688_p2) }
  0x19   : > { %s4523_s2 = smov (!%p755_p3, %s2847_s2), 1 }
  0x1a   : > { %s3256_s6 = smul.u32 80, %s4523_s2 }
  0x1c   : > { %s759_s26 = scalar_lea.vmem %s4492_s3, %s3256_s6  ;;  %s4493_s6 = sld [smem:[#allocation6_spill]]  ;;  %v850_v62 = vld [vmem:[%s4494_s0] sm:$0xff] }
  0x1d   : > { %v772_v0 = vld [vmem:[%s759_s26 + $0x30] sm:$0xff]  ;;  %v773_v1 = vld [vmem:[%s759_s26 + $0x38] sm:$0xff]  ;;  %v774_v2 = vld [vmem:[%s759_s26 + $0x40] sm:$0xff]  ;;  %s4505_s3 = smov 3  }
  0x1e   : > { %v3297_v3 = vpack.i.bf16 %v773_v1, %v772_v0  ;;  %v775_v4 = vld [vmem:[%s759_s26 + $0x48] sm:$0xff]  ;;  %v766_v5 = vld [vmem:[%s759_s26] sm:$0xff]  ;;  %v768_v8 = vld [vmem:[%s759_s26 + $0x10] sm:$0xff] }
  0x1f   : > { %v767_v6 = vld [vmem:[%s759_s26 + $0x8] sm:$0xff]  ;;  %v769_v9 = vld [vmem:[%s759_s26 + $0x18] sm:$0xff]  ;;  %v3302_v10 = vpack.i.bf16 %v775_v4, %v774_v2  ;;  %v770_v11 = vld [vmem:[%s759_s26 + $0x20] sm:$0xff] }
  0x20   : > { %v3307_v7 = vpack.i.bf16 %v767_v6, %v766_v5  ;;  %3298 = vrot.lane.b32.xlu0 %v3297_v3, %s4460_s1  ;;  %v3312_v12 = vpack.i.bf16 %v769_v9, %v768_v8  ;;  %v771_v13 = vld [vmem:[%s759_s26 + $0x28] sm:$0xff]  ;;  %v852_v1 = vld [vmem:[%s4494_s0 + $0x10] sm:$0xff]  ;;  %v853_v2 = vld [vmem:[%s4494_s0 + $0x18] sm:$0xff]  ;;  %s3664_s26 = smov 116  }
  0x21   : > { %v3317_v14 = vpack.i.bf16 %v771_v13, %v770_v11  ;;  %v851_v0 = vld [vmem:[%s4494_s0 + $0x8] sm:$0xff]  ;;  %s4515_s0 = smov 6  }
  0x22   : > { %3308 = vrot.lane.b32.xlu1 %v3307_v7, %s4460_s1  ;;  %v3616_v60 = vld [vmem:[%s4493_s6 + $0x4] ss:$20 sps:$4 sm:$0xff]   ;;  %v3622_v61 = vld [vmem:[%s4493_s6 + $0xc] ss:$20 sps:$4 sm:$0xff]  }
  0x23   : > { %1188 = vmatprep.mubr.bf16.mxu0 %v3616_v60  ;;  %1237 = vmatprep.mubr.bf16.mxu1 %v3622_v61 }
  0x24   : > { %3303 = vrot.lane.b32.xlu0 %v3302_v10, %s4460_s1 }
  0x26   : > { %3313 = vrot.lane.b32.xlu1 %v3312_v12, %s4460_s1 }
  0x28   : > { %3318 = vrot.lane.b32.xlu0 %v3317_v14, %s4460_s1  ;;  %s4468_s1 = smov 2  }
  0x92   : > { %v3299_v15 = vpop.permute.xlu0 %3298 }
  0x93   : > { %v3301_v16 = vunpack.i.h.bf16 %v3299_v15  ;;  %v3300_v17 = vunpack.i.l.bf16 %v3299_v15 }
  0x94   : > { %v3309_v18 = vpop.permute.xlu1 %3308 }
  0x95   : > { %v3311_v19 = vunpack.i.h.bf16 %v3309_v18  ;;  %v3310_v20 = vunpack.i.l.bf16 %v3309_v18  ;;  %v3824_v21 = vsel %vm816_vm0, 0.0, %v3301_v16  ;;  %v3827_v22 = vsel %vm816_vm0, 0.0, %v3300_v17 }
  0x96   : > { %v835_v23 = vsel %vm827_vm1, %v3824_v21, 0.0  ;;  %v834_v24 = vsel %vm827_vm1, %v3827_v22, 0.0  ;;  %v2875_v25 = vpack.c.bf16 %v3824_v21, %v3827_v22  ;;  %v3304_v26 = vpop.permute.xlu0 %3303 }
  0x97   : > { %v3836_v27 = vsel %vm816_vm0, 0.0, %v3311_v19  ;;  %v3306_v28 = vunpack.i.h.bf16 %v3304_v26  ;;  %v3305_v29 = vunpack.i.l.bf16 %v3304_v26  ;;  %v3841_v31 = vsel %vm816_vm0, 0.0, %v3310_v20 }
  0x98   : > { %v829_v30 = vsel %vm827_vm1, %v3836_v27, 0.0  ;;  %v3314_v32 = vpop.permute.xlu1 %3313  ;;  %v828_v33 = vsel %vm827_vm1, %v3841_v31, 0.0  ;;  %v3845_v34 = vpack.i.bf16 %v835_v23, %v834_v24  ;;  %v2866_v58 = vpack.c.bf16 %v3836_v27, %v3841_v31 }
  0x99   : > { %v3316_v35 = vunpack.i.h.bf16 %v3314_v32  ;;  %v3315_v36 = vunpack.i.l.bf16 %v3314_v32  ;;  %v3848_v37 = vsel %vm816_vm0, 0.0, %v3306_v28  ;;  %v3851_v38 = vsel %vm816_vm0, 0.0, %v3305_v29 }
  0x9a   : > { %v3332_v39 = vpack.i.bf16 %v829_v30, %v828_v33  ;;  %v837_v40 = vsel %vm827_vm1, %v3848_v37, 0.0  ;;  %v836_v41 = vsel %vm827_vm1, %v3851_v38, 0.0  ;;  %v2878_v42 = vpack.c.bf16 %v3848_v37, %v3851_v38  ;;  %3323 = vrot.lane.b32.xlu1 %v3845_v34, %s4471_s8  ;;  %v3319_v44 = vpop.permute.xlu0 %3318 }
  0x9b   : > { %v3862_v43 = vsel %vm816_vm0, 0.0, %v3316_v35  ;;  %v3867_v46 = vsel %vm816_vm0, 0.0, %v3315_v36  ;;  %v3327_v47 = vpack.i.bf16 %v837_v40, %v836_v41  ;;  %v3321_v50 = vunpack.i.h.bf16 %v3319_v44 }
  0x9c   : > { %v831_v45 = vsel %vm827_vm1, %v3862_v43, 0.0  ;;  %v830_v48 = vsel %vm827_vm1, %v3867_v46, 0.0  ;;  %v2869_v49 = vpack.c.bf16 %v3862_v43, %v3867_v46  ;;  %v3320_v51 = vunpack.i.l.bf16 %v3319_v44 }
  0x9d   : > { %3328 = vrot.lane.b32.xlu0 %v3327_v47, %s4471_s8  ;;  %v3342_v52 = vpack.i.bf16 %v831_v45, %v830_v48  ;;  %v3876_v53 = vsel %vm816_vm0, 0.0, %v3321_v50 }
  0x9e   : > { %3333 = vrot.lane.b32.xlu1 %v3332_v39, %s4474_s27  ;;  %v3879_v54 = vsel %vm816_vm0, 0.0, %v3320_v51  ;;  %v833_v56 = vsel %vm827_vm1, %v3876_v53, 0.0 }
  0x9f   : > { %v2872_v55 = vpack.c.bf16 %v3876_v53, %v3879_v54  ;;  %v832_v57 = vsel %vm827_vm1, %v3879_v54, 0.0  ;;  %vm1570_vm1 = vcmask 7168  }
  0xa0   : > { %v3357_v59 = vpack.i.bf16 %v833_v56, %v832_v57 }
  0xa1   : > { %3338 = vrot.lane.b32.xlu0 %v3327_v47, %s4462_s4 }
  0xa2   : > { %3343 = vrot.lane.b32.xlu1 %v3342_v52, %s4464_s28 }
  0xa5   : > { %3348 = vrot.lane.b32.xlu0 %v3342_v52, %s4474_s27 }
  0xa6   : > { %3353 = vrot.lane.b32.xlu1 %v3332_v39, %s4459_s9 }
  0xa9   : > { %3358 = vrot.lane.b32.xlu0 %v3357_v59, %s4464_s28 }
  0xaa   : > { %3363 = vrot.lane.b32.xlu1 %v3357_v59, %s4474_s27 }
  0xad   : > { %3368 = vrot.lane.b32.xlu0 %v3342_v52, %s4459_s9 }
  0xae   : > { %3373 = vrot.lane.b32.xlu1 %v3845_v34, %s4464_s28 }
  0xb1   : > { %3378 = vrot.lane.b32.xlu0 %v3845_v34, %s4474_s27 }
  0xb2   : > { %3383 = vrot.lane.b32.xlu1 %v3357_v59, %s4459_s9 }
  0xb5   : > { %3388 = vrot.lane.b32.xlu0 %v3332_v39, %s4471_s8 }
  0xb6   : > { %3393 = vrot.lane.b32.xlu1 %v3327_v47, %s4464_s28 }
  0xb9   : > { %3398 = vrot.lane.b32.xlu0 %v3327_v47, %s4474_s27 }
  0xba   : > { %3403 = vrot.lane.b32.xlu1 %v3845_v34, %s4459_s9 }
  0xbd   : > { %3408 = vrot.lane.b32.xlu0 %v3342_v52, %s4471_s8 }
  0xbe   : > { %3413 = vrot.lane.b32.xlu1 %v3332_v39, %s4462_s4 }
  0xc1   : > { %3418 = vrot.lane.b32.xlu0 %v3332_v39, %s4464_s28  ;;  %s4466_s28 = smov 1  }
  0xc2   : > { %3423 = vrot.lane.b32.xlu1 %v3327_v47, %s4459_s9  ;;  %s4506_s9 = smov 124  }
  0xc5   : > { %3428 = vrot.lane.b32.xlu0 %v3357_v59, %s4471_s8 }
  0xc6   : > { %3433 = vrot.lane.b32.xlu1 %v3342_v52, %s4462_s4 }
  0xc9   : > { %3438 = vrot.lane.b32.xlu0 %v3332_v39, %s4477_s30 }
  0xca   : > { %3443 = vrot.lane.b32.xlu1 %v3357_v59, %s4462_s4 }
  0xcd   : > { %3448 = vrot.lane.b32.xlu0 %v3342_v52, %s4477_s30 }
  0xce   : > { %3453 = vrot.lane.b32.xlu1 %v3357_v59, %s4477_s30 }
  0xd1   : > { %3458 = vrot.lane.b32.xlu0 %v3845_v34, %s4462_s4  ;;  %s4501_s4 = smov 125  }
  0xd2   : > { %3463 = vrot.lane.b32.xlu1 %v3845_v34, %s4477_s30 }
  0xd5   : > { %3468 = vrot.lane.b32.xlu0 %v3327_v47, %s4477_s30 }
  0xd6   : > { %1081 = vperm.xlu1 %3472, %v850_v62  }
  0xd9   : > { %1086 = vperm.xlu0 %3473, %v851_v0  }
  0xda   : > { %1091 = vperm.xlu1 %3472, %v852_v1  }
  0xde   : > { %1096 = vperm.xlu1 %3472, %v853_v2  }
 0x10c   : > { %v3324_v3 = vpop.permute.xlu1 %3323 }
 0x10d   : > { %v3326_v4 = vunpack.i.h.bf16 %v3324_v3  ;;  %v3325_v5 = vunpack.i.l.bf16 %v3324_v3 }
 0x10f   : > { %v3329_v6 = vpop.permute.xlu0 %3328  ;;  %v1052_v7 = vpack.c.bf16 %v3326_v4, %v3325_v5 }
 0x110   : > { %v3331_v9 = vunpack.i.h.bf16 %v3329_v6  ;;  %v3330_v10 = vunpack.i.l.bf16 %v3329_v6  ;;  %v3334_v11 = vpop.permute.xlu1 %3333 }
 0x111   : > { %v3336_v12 = vunpack.i.h.bf16 %v3334_v11  ;;  %v3335_v13 = vunpack.i.l.bf16 %v3334_v11  ;;  %2956 = vmatprep.subr.bf16.mxu0 %v1052_v7 }
 0x112   : > { %2957 = vmatpush3.bf16.msk.msra.mxu0 %vm3941_vm2, %v2866_v58  ;;  %v1053_v14 = vpack.c.bf16 %v3331_v9, %v3330_v10 }
 0x113   : > { %v3339_v15 = vpop.permute.xlu0 %3338  ;;  %v1054_v16 = vpack.c.bf16 %v3336_v12, %v3335_v13 }
 0x114   : > { %v3344_v17 = vpop.permute.xlu1 %3343  ;;  %2958 = vmatprep.subr.bf16.mxu0 %v1053_v14  ;;  %v3341_v18 = vunpack.i.h.bf16 %v3339_v15  ;;  %v3340_v19 = vunpack.i.l.bf16 %v3339_v15 }
 0x115   : > { %v3346_v20 = vunpack.i.h.bf16 %v3344_v17  ;;  %v3345_v23 = vunpack.i.l.bf16 %v3344_v17 }
 0x116   : > { %2959 = vmatpush3.bf16.msk.msra.mxu0 %vm3941_vm2, %v2869_v49  ;;  %v1068_v24 = vpack.c.bf16 %v3341_v18, %v3340_v19 }
 0x117   : > { %2960 = vmatprep.subr.bf16.mxu0 %v1054_v16  ;;  %v3349_v26 = vpop.permute.xlu0 %3348  ;;  %v1060_v27 = vpack.c.bf16 %v3346_v20, %v3345_v23 }
 0x118   : > { %v3351_v28 = vunpack.i.h.bf16 %v3349_v26  ;;  %v3350_v29 = vunpack.i.l.bf16 %v3349_v26  ;;  %v3354_v30 = vpop.permute.xlu1 %3353  ;;  %2984 = vmatprep.subr.bf16.mxu1 %v1068_v24 }
 0x119   : > { %v3356_v31 = vunpack.i.h.bf16 %v3354_v30  ;;  %v3355_v32 = vunpack.i.l.bf16 %v3354_v30  ;;  %2985 = vmatpush3.bf16.msra.mxu1 %v1060_v27 }
 0x11a   : > { %v1055_v33 = vpack.c.bf16 %v3351_v28, %v3350_v29  ;;  %2961 = vmatpush3.bf16.msk.msra.mxu0 %vm3941_vm2, %v2872_v55 }
 0x11b   : > { %v3359_v34 = vpop.permute.xlu0 %3358  ;;  %v1069_v35 = vpack.c.bf16 %v3356_v31, %v3355_v32 }
 0x11c   : > { %v3361_v36 = vunpack.i.h.bf16 %v3359_v34  ;;  %v3360_v39 = vunpack.i.l.bf16 %v3359_v34  ;;  %v3364_v40 = vpop.permute.xlu1 %3363  ;;  %2962 = vmatprep.subr.bf16.mxu0 %v1055_v33 }
 0x11d   : > { %v3366_v41 = vunpack.i.h.bf16 %v3364_v40  ;;  %v3365_v43 = vunpack.i.l.bf16 %v3364_v40  ;;  %2986 = vmatprep.subr.bf16.mxu1 %v1069_v35 }
 0x11e   : > { %v1061_v44 = vpack.c.bf16 %v3361_v36, %v3360_v39  ;;  %2963 = vmatpush3.bf16.msk.msra.mxu0 %vm3941_vm2, %v2875_v25  ;;  %v3614_v36 = vld [vmem:[%s4493_s6] ss:$20 sps:$4 sm:$0xff]  }
 0x11f   : > { %v1056_v45 = vpack.c.bf16 %v3366_v41, %v3365_v43  ;;  %v3369_v46 = vpop.permute.xlu0 %3368  ;;  %v3617_v43 = vld [vmem:[%s4493_s6 + $0x2c] ss:$20 sps:$4 sm:$0xff]  }
 0x120   : > { %v3371_v47 = vunpack.i.h.bf16 %v3369_v46  ;;  %v3370_v48 = vunpack.i.l.bf16 %v3369_v46  ;;  %v3374_v49 = vpop.permute.xlu1 %3373  ;;  %2987 = vmatpush3.bf16.msra.mxu1 %v1061_v44 }
 0x121   : > { %v3376_v50 = vunpack.i.h.bf16 %v3374_v49  ;;  %v3375_v51 = vunpack.i.l.bf16 %v3374_v49  ;;  %2964 = vmatprep.subr.bf16.mxu0 %v1056_v45 }
 0x122   : > { %v1070_v52 = vpack.c.bf16 %v3371_v47, %v3370_v48  ;;  %2965 = vmatpush3.bf16.msk.msra.mxu0 %vm3941_vm2, %v2878_v42 }
 0x123   : > { %v1062_v21 = vpack.c.bf16 %v3376_v50, %v3375_v51  ;;  %v3379_v22 = vpop.permute.xlu0 %3378 }
 0x124   : > { %v3381_v53 = vunpack.i.h.bf16 %v3379_v22  ;;  %v3380_v25 = vunpack.i.l.bf16 %v3379_v22  ;;  %v3384_v54 = vpop.permute.xlu1 %3383  ;;  %2988 = vmatprep.subr.bf16.mxu1 %v1070_v52 }
 0x125   : > { %v3386_v55 = vunpack.i.h.bf16 %v3384_v54  ;;  %v3385_v56 = vunpack.i.l.bf16 %v3384_v54  ;;  %2989 = vmatpush3.bf16.msra.mxu1 %v1062_v21  ;;  %v3619_v54 = vld [vmem:[%s4493_s6 + $0x28] ss:$20 sps:$4 sm:$0xff]  }
 0x126   : > { %v1057_v57 = vpack.c.bf16 %v3381_v53, %v3380_v25 }
 0x127   : > { %v1071_v58 = vpack.c.bf16 %v3386_v55, %v3385_v56  ;;  %v3389_v59 = vpop.permute.xlu0 %3388 }
 0x128   : > { %v3391_v60 = vunpack.i.h.bf16 %v3389_v59  ;;  %v3390_v61 = vunpack.i.l.bf16 %v3389_v59  ;;  %v3394_v62 = vpop.permute.xlu1 %3393  ;;  %2966 = vmatprep.subr.bf16.mxu0 %v1057_v57 }
 0x129   : > { %v3396_v37 = vunpack.i.h.bf16 %v3394_v62  ;;  %v3395_v38 = vunpack.i.l.bf16 %v3394_v62  ;;  %2990 = vmatprep.subr.bf16.mxu1 %v1071_v58  ;;  %v3623_v58 = vld [vmem:[%s4493_s6 + $0x10] ss:$20 sps:$4 sm:$0xff]  }
 0x12a   : > { %v1049_v42 = vpack.c.bf16 %v3391_v60, %v3390_v61 }
 0x12b   : > { %v1063_v63 = vpack.c.bf16 %v3396_v37, %v3395_v38  ;;  %v3399_v0 = vpop.permute.xlu0 %3398  ;;  %v3620_v38 = vld [vmem:[%s4493_s6 + $0x8] ss:$20 sps:$4 sm:$0xff]  }
 0x12c   : > { %v3401_v1 = vunpack.i.h.bf16 %v3399_v0  ;;  %v3400_v2 = vunpack.i.l.bf16 %v3399_v0  ;;  %v3404_v3 = vpop.permute.xlu1 %3403  ;;  %2967 = vmatpush3.bf16.msra.mxu0 %v1049_v42  ;;  %v3625_v0 = vld [vmem:[%s4493_s6 + $0x34] ss:$20 sps:$4 sm:$0xff]  }
 0x12d   : > { %v3406_v4 = vunpack.i.h.bf16 %v3404_v3  ;;  %v3405_v5 = vunpack.i.l.bf16 %v3404_v3  ;;  %2991 = vmatpush3.bf16.msra.mxu1 %v1063_v63  ;;  %v3627_v3 = vld [vmem:[%s4493_s6 + $0x30] ss:$20 sps:$4 sm:$0xff]  }
 0x12e   : > { %v1058_v6 = vpack.c.bf16 %v3401_v1, %v3400_v2  ;;  %v3624_v2 = vld [vmem:[%s4493_s6 + $0x38] ss:$20 sps:$4 sm:$0xff]   ;;  %s4512_s6 = smov 126  }
 0x12f   : > { %v1072_v7 = vpack.c.bf16 %v3406_v4, %v3405_v5  ;;  %v3409_v8 = vpop.permute.xlu0 %3408  ;;  %v1315_v4 = vlaneseq }
 0x130   : > { %v3411_v9 = vunpack.i.h.bf16 %v3409_v8  ;;  %v3410_v10 = vunpack.i.l.bf16 %v3409_v8  ;;  %v3414_v11 = vpop.permute.xlu1 %3413  ;;  %2968 = vmatprep.subr.bf16.mxu0 %v1058_v6 }
 0x131   : > { %v3416_v12 = vunpack.i.h.bf16 %v3414_v11  ;;  %v3415_v13 = vunpack.i.l.bf16 %v3414_v11  ;;  %2992 = vmatprep.subr.bf16.mxu1 %v1072_v7  ;;  %v3993_v5 = vshrl.u32 %v1315_v4, 7  ;;  %v3995_v6 = vand.u32 127, %v1315_v4 }
 0x132   : > { %v1050_v14 = vpack.c.bf16 %v3411_v9, %v3410_v10  ;;  %v3658_v9 = vmov 1.0  }
 0x133   : > { %v1064_v15 = vpack.c.bf16 %v3416_v12, %v3415_v13  ;;  %v3419_v16 = vpop.permute.xlu0 %3418  ;;  %v1319_v7 = vmul.u32 2, %v3993_v5 }
 0x134   : > { %v3421_v17 = vunpack.i.h.bf16 %v3419_v16  ;;  %v3420_v18 = vunpack.i.l.bf16 %v3419_v16  ;;  %v3424_v19 = vpop.permute.xlu1 %3423  ;;  %2969 = vmatpush3.bf16.msra.mxu0 %v1050_v14 }
 0x135   : > { %v3426_v20 = vunpack.i.h.bf16 %v3424_v19  ;;  %v3425_v23 = vunpack.i.l.bf16 %v3424_v19  ;;  %2993 = vmatpush3.bf16.msra.mxu1 %v1064_v15  ;;  %vm3999_vm4 = vcmp.eq.s32.totalorder %v3995_v6, %v1319_v7 }
 0x136   : > { %v1059_v24 = vpack.c.bf16 %v3421_v17, %v3420_v18 }
 0x137   : > { %v1073_v26 = vpack.c.bf16 %v3426_v20, %v3425_v23  ;;  %v3429_v27 = vpop.permute.xlu0 %3428 }
 0x138   : > { %v3431_v28 = vunpack.i.h.bf16 %v3429_v27  ;;  %v3430_v29 = vunpack.i.l.bf16 %v3429_v27  ;;  %v3434_v30 = vpop.permute.xlu1 %3433  ;;  %2970 = vmatprep.subr.bf16.mxu0 %v1059_v24 }
 0x139   : > { %v3436_v31 = vunpack.i.h.bf16 %v3434_v30  ;;  %v3435_v32 = vunpack.i.l.bf16 %v3434_v30  ;;  %2994 = vmatprep.subr.bf16.mxu1 %v1073_v26 }
 0x13a   : > { %v1051_v33 = vpack.c.bf16 %v3431_v28, %v3430_v29 }
 0x13b   : > { %v1065_v34 = vpack.c.bf16 %v3436_v31, %v3435_v32  ;;  %v3439_v35 = vpop.permute.xlu0 %3438 }
 0x13c   : > { %v3441_v39 = vunpack.i.h.bf16 %v3439_v35  ;;  %v3440_v40 = vunpack.i.l.bf16 %v3439_v35  ;;  %v3444_v41 = vpop.permute.xlu1 %3443  ;;  %2971 = vmatpush3.bf16.msra.mxu0 %v1051_v33 }
 0x13d   : > { %v3446_v44 = vunpack.i.h.bf16 %v3444_v41  ;;  %v3445_v45 = vunpack.i.l.bf16 %v3444_v41  ;;  %2995 = vmatpush3.bf16.msra.mxu1 %v1065_v34 }
 0x13e   : > { %v1074_v46 = vpack.c.bf16 %v3441_v39, %v3440_v40 }
 0x13f   : > { %v1066_v47 = vpack.c.bf16 %v3446_v44, %v3445_v45  ;;  %v3449_v48 = vpop.permute.xlu0 %3448  ;;  %1189 = vmatmul.mubr.bf16.vlgmr.msra.gmra.mrb[0].mxu0 %v3614_v36 }
 0x140   : > { %v3451_v49 = vunpack.i.h.bf16 %v3449_v48  ;;  %v3450_v50 = vunpack.i.l.bf16 %v3449_v48  ;;  %v3454_v51 = vpop.permute.xlu1 %3453  ;;  %2996 = vmatprep.subr.bf16.mxu1 %v1074_v46  ;;  %1196 = vmatprep.mubr.bf16.mxu0 %v3617_v43 }
 0x141   : > { %v3456_v52 = vunpack.i.h.bf16 %v3454_v51  ;;  %v3455_v21 = vunpack.i.l.bf16 %v3454_v51  ;;  %2997 = vmatpush3.bf16.msra.mxu1 %v1066_v47 }
 0x142   : > { %v1075_v22 = vpack.c.bf16 %v3451_v49, %v3450_v50 }
 0x143   : > { %v1076_v53 = vpack.c.bf16 %v3456_v52, %v3455_v21  ;;  %v3459_v25 = vpop.permute.xlu0 %3458 }
 0x144   : > { %v3461_v55 = vunpack.i.h.bf16 %v3459_v25  ;;  %v3460_v56 = vunpack.i.l.bf16 %v3459_v25  ;;  %v3464_v57 = vpop.permute.xlu1 %3463  ;;  %2998 = vmatprep.subr.bf16.mxu1 %v1075_v22 }
 0x145   : > { %v3466_v59 = vunpack.i.h.bf16 %v3464_v57  ;;  %v3465_v60 = vunpack.i.l.bf16 %v3464_v57  ;;  %3079 = vmatprep.subr.bf16.mxu0 %v1076_v53 }
 0x146   : > { %v1067_v61 = vpack.c.bf16 %v3461_v55, %v3460_v56  ;;  %3080 = vmatpush3.bf16.msra.mxu0 %v1076_v53 }
 0x147   : > { %v1077_v62 = vpack.c.bf16 %v3466_v59, %v3465_v60  ;;  %v3469_v37 = vpop.permute.xlu0 %3468  ;;  %1197 = vmatmul.mubr.bf16.gmra.mrb[4].mxu0 %v3619_v54 }
 0x148   : > { %v3471_v42 = vunpack.i.h.bf16 %v3469_v37  ;;  %v3470_v63 = vunpack.i.l.bf16 %v3469_v37  ;;  %2999 = vmatpush3.bf16.msra.mxu1 %v1067_v61  ;;  %3085 = vmatprep.mubr.msk.bf16.mxu0 %vm1149_vm3, %v3623_v58 }
 0x149   : > { %3081 = vmatprep.subr.bf16.mxu0 %v1077_v62  ;;  %3089 = vmatprep.subr.msk.mxu1 %vm3999_vm4, %v3658_v9 }
 0x14a   : > { %v1078_v1 = vpack.c.bf16 %v3471_v42, %v3470_v63  ;;  %3082 = vmatpush3.bf16.msra.mxu0 %v1077_v62  ;;  %v3659_v42 = vmov 0.0  }
 0x14b   : > { %1238 = vmatmul.mubr.bf16.vlgmr.msra.gmra.mrb[0].mxu1 %v3620_v38 }
 0x14c   : > { %3083 = vmatprep.subr.bf16.mxu0 %v1078_v1  ;;  %1245 = vmatprep.mubr.bf16.mxu1 %v3625_v0 }
 0x14d   : > { %3090 = vmatpush3.msk.msra.mxu1 %vm3999_vm4, %v3658_v9 }
 0x14e   : > { %3084 = vmatpush3.bf16.msra.mxu0 %v1078_v1  ;;  %3117 = vmatprep.subr.bf16.mxu1 %v3659_v42 }
 0x14f   : > { %3097 = vmatprep.subr.bf16.mxu0 %v3659_v42 }
 0x151   : > { %3086 = vmatmul.mubr.msk.bf16.vlgmr.msra.gmra.mrb[8].mxu0 %vm1149_vm3, %v3624_v2 }
 0x152   : > { %3113 = vmatprep.mubr.msk.bf16.mxu0 %vm3661_vm13, %v3659_v42 }
 0x153   : > { %1246 = vmatmul.mubr.bf16.gmra.mrb[4].mxu1 %v3627_v3 }
 0x155   : > { %v1082_v16 = vpop.permute.xlu1 %1081 }
 0x158   : > { %v1087_v24 = vpop.permute.xlu0 %1086 }
 0x159   : > { %v1092_v28 = vpop.permute.xlu1 %1091 }
 0x15d   : > { %v1097_v41 = vpop.permute.xlu1 %1096 }
 0x212   : > { %v2972_v10 = vpop.f32.mrb[0].mxu0 }
 0x213   : > { %v2973_v11 = vpop.f32.mrb[1].mxu0 }
 0x214   : > { %v2974_v12 = vadd.f32 %v2973_v11, %v2972_v10  ;;  %v2975_v13 = vpop.f32.mrb[2].mxu0 }
 0x215   : > { %v2976_v14 = vpop.f32.mrb[3].mxu0 }
 0x216   : > { %v2977_v15 = vadd.f32 %v2976_v14, %v2975_v13  ;;  %v1191_v30 = vadd.f32 %v2974_v12, %v1082_v16 }
 0x218   : > { %v1194_v34 = vadd.f32 %v2977_v15, %v1087_v24 }
 0x21a   : > { %v2978_v17 = vpop.f32.mrb[4].mxu0 }
 0x21b   : > { %v2979_v18 = vpop.f32.mrb[5].mxu0 }
 0x21c   : > { %v2980_v19 = vadd.f32 %v2979_v18, %v2978_v17  ;;  %v2981_v20 = vpop.f32.mrb[6].mxu0 }
 0x21d   : > { %v2982_v23 = vpop.f32.mrb[7].mxu0 }
 0x21e   : > { %v3000_v26 = vpop.f32.mrb[0].mxu1  ;;  %v2983_v27 = vadd.f32 %v2982_v23, %v2981_v20  ;;  %v1199_v47 = vadd.f32 %v2980_v19, %v1092_v28 }
 0x21f   : > { %v3001_v29 = vpop.f32.mrb[1].mxu1 }
 0x220   : > { %v3002_v31 = vadd.f32 %v3001_v29, %v3000_v26  ;;  %v3003_v32 = vpop.f32.mrb[2].mxu1  ;;  %v1202_v22 = vadd.f32 %v2983_v27, %v1097_v41 }
 0x221   : > { %v3004_v33 = vpop.f32.mrb[3].mxu1 }
 0x222   : > { %v3005_v35 = vadd.f32 %v3004_v33, %v3003_v32  ;;  %v1240_v36 = vadd.f32 %v3002_v31, %v1191_v30  ;;  %v1449_v30 = vld [vmem:[%s4502_s21] sm:$0xff]  ;;  %v1450_v31 = vld [vmem:[%s4502_s21 + $0x8] sm:$0xff]  ;;  %s4514_s21 = smov 1  }
 0x224   : > { %v3087_v39 = vpop.f32.mrb[8].mxu0  ;;  %v1243_v40 = vadd.f32 %v3005_v35, %v1194_v34 }
 0x225   : > { %v1288_v43 = vpop.f32.mrb[9].mxu0 }
 0x226   : > { %v1289_v44 = vadd.f32 %v1288_v43, %v1240_v36  ;;  %v3088_v45 = vpop.f32.mrb[10].mxu0  ;;  %v3006_v46 = vpop.f32.mrb[4].mxu1 }
 0x227   : > { %v1291_v48 = vpop.f32.mrb[11].mxu0  ;;  %v3007_v49 = vpop.f32.mrb[5].mxu1 }
 0x228   : > { %vm1303_vm5 = vcmp.ge.f32.partialorder %v1289_v44, 0.0  ;;  %v1307_v50 = vmul.f32 0.1, %v1289_v44  ;;  %v1292_v51 = vadd.f32 %v1291_v48, %v1243_v40  ;;  %v3008_v52 = vadd.f32 %v3007_v49, %v3006_v46  ;;  %v3009_v21 = vpop.f32.mrb[6].mxu1 }
 0x229   : > { %v3010_v53 = vpop.f32.mrb[7].mxu1 }
 0x22a   : > { %vm1304_vm7 = vcmp.ge.f32.partialorder %v1292_v51, 0.0  ;;  %v1308_v25 = vmul.f32 0.1, %v1292_v51  ;;  %v1248_v54 = vadd.f32 %v3008_v52, %v1199_v47  ;;  %v3011_v55 = vadd.f32 %v3010_v53, %v3009_v21 }
 0x22b   : > { %v1311_v56 = vsel %vm1303_vm5, %v1289_v44, %v1307_v50 }
 0x22c   : > { %v1312_v57 = vsel %vm1304_vm7, %v1292_v51, %v1308_v25  ;;  %v1297_v58 = vadd.f32 %v3087_v39, %v1248_v54  ;;  %v1251_v59 = vadd.f32 %v3011_v55, %v1202_v22  ;;  %3091 = vmatprep.mubr.msk.f32.mxu1 %vm1323_vm6, %v1311_v56  ;;  %v3628_v56 = vld [vmem:[%s4449_s22] sm:$0xff]   ;;  %vm1766_vm7 = vcmask 146432  }
 0x22d   : > { %3092 = vmatmul.mubr.msk.f32.vlgmr.msra.gmra.mrb[8].mxu1 %vm1323_vm6, %v1312_v57 }
 0x22e   : > { %v1300_v60 = vadd.f32 %v3088_v45, %v1251_v59  ;;  %vm1305_vm8 = vcmp.ge.f32.partialorder %v1297_v58, 0.0  ;;  %v1309_v61 = vmul.f32 0.1, %v1297_v58 }
 0x230   : > { %v1313_v62 = vsel %vm1305_vm8, %v1297_v58, %v1309_v61  ;;  %vm1306_vm9 = vcmp.ge.f32.partialorder %v1300_v60, 0.0  ;;  %v1310_v37 = vmul.f32 0.1, %v1300_v60 }
 0x231   : > { %3094 = vmatprep.mubr.msk.f32.mxu1 %vm1323_vm6, %v1313_v62 }
 0x232   : > { %v1314_v38 = vsel %vm1306_vm9, %v1300_v60, %v1310_v37  ;;  %vm2906_vm9 = vmpackc.low %vm1766_vm7, %vm1766_vm7 }
 0x233   : > { %3095 = vmatmul.mubr.msk.f32.gmra.mrb[10].mxu1 %vm1323_vm6, %v1314_v38  ;;  %vm1673_vm6 = vcmask 154624  }
 0x234   : > { %3123 = vmatprep.mubr.msk.bf16.mxu1 %vm3661_vm13, %v3659_v42  ;;  %vm2901_vm8 = vmpackc.low %vm1673_vm6, %vm1673_vm6 }
 0x300   : > { %v3093_v63 = vpop.f32.mrb[8].mxu1 }
 0x301   : > { %v1402_v0 = vpop.f32.mrb[9].mxu1 }
 0x302   : > { %v3474_v1 = vpack.i.bf16 %v3093_v63, %v1402_v0 }
 0x304   : > { %3475 = vrot.lane.b32.xlu0 %v3474_v1, %s4468_s1 }
 0x306   : > { %v3096_v2 = vpop.f32.mrb[10].mxu1 }
 0x307   : > { %v1412_v3 = vpop.f32.mrb[11].mxu1 }
 0x308   : > { %v3479_v4 = vpack.i.bf16 %v3096_v2, %v1412_v3 }
 0x30a   : > { %3480 = vrot.lane.b32.xlu1 %v3479_v4, %s4468_s1 }
 0x376   : > { %v3476_v7 = vpop.permute.xlu0 %3475 }
 0x377   : > { %v3478_v9 = vunpack.i.h.bf16 %v3476_v7  ;;  %v3477_v10 = vunpack.i.l.bf16 %v3476_v7 }
 0x379   : > { %v1439_v11 = vsel %vm1437_vm10, 0.0, %v3478_v9  ;;  %v1438_v12 = vsel %vm1437_vm10, 0.0, %v3477_v10 }
 0x37a   : > { %v1444_v14 = vsel %vm1442_vm11, %v1439_v11, 0.0  ;;  %v1443_v15 = vsel %vm1442_vm11, %v1438_v12, 0.0  ;;  %v2890_v16 = vpack.c.bf16 %v1439_v11, %v1438_v12 }
 0x37b   : > { %v3484_v17 = vpack.i.bf16 %v1444_v14, %v1443_v15 }
 0x37c   : > { %3098 = vmatpush3.bf16.msk.msra.mxu0 %vm4019_vm12, %v2890_v16  ;;  %v3481_v18 = vpop.permute.xlu1 %3480 }
 0x37d   : > { %3485 = vrot.lane.b32.xlu0 %v3484_v17, %s4471_s8  ;;  %v3483_v19 = vunpack.i.h.bf16 %v3481_v18  ;;  %v3482_v20 = vunpack.i.l.bf16 %v3481_v18  ;;  %3099 = vmatprep.subr.bf16.mxu0 %v3659_v42  ;;  %v1577_v18 = vld [vmem:[%s4503_s5] sm:$0xff] }
 0x37f   : > { %v1441_v23 = vsel %vm1437_vm10, 0.0, %v3483_v19  ;;  %v1440_v24 = vsel %vm1437_vm10, 0.0, %v3482_v20 }
 0x380   : > { %v1446_v26 = vsel %vm1442_vm11, %v1441_v23, 0.0  ;;  %v1445_v27 = vsel %vm1442_vm11, %v1440_v24, 0.0  ;;  %v2893_v28 = vpack.c.bf16 %v1441_v23, %v1440_v24 }
 0x381   : > { %3495 = vrot.lane.b32.xlu0 %v3484_v17, %s4474_s27  ;;  %v3489_v29 = vpack.i.bf16 %v1446_v26, %v1445_v27 }
 0x382   : > { %3100 = vmatpush3.bf16.msk.msra.mxu0 %vm4019_vm12, %v2893_v28 }
 0x383   : > { %3490 = vrot.lane.b32.xlu1 %v3489_v29, %s4471_s8  ;;  %3101 = vmatprep.subr.bf16.mxu0 %v3659_v42 }
 0x385   : > { %3505 = vrot.lane.b32.xlu0 %v3484_v17, %s4501_s4  ;;  %v1578_v17 = vld [vmem:[%s4503_s5 + $0x8] sm:$0xff] }
 0x387   : > { %3500 = vrot.lane.b32.xlu1 %v3489_v29, %s4474_s27 }
 0x389   : > { %1501 = vperm.xlu0 %3473, %v1449_v30  }
 0x38b   : > { %3510 = vrot.lane.b32.xlu1 %v3489_v29, %s4501_s4  ;;  %v3629_v29 = vld [vmem:[%s4504_s7] sm:$0xff]   ;;  %s3665_s7 = smov 119  }
 0x38f   : > { %1506 = vperm.xlu1 %3472, %v1450_v31  }
 0x3ef   : > { %v3486_v32 = vpop.permute.xlu0 %3485 }
 0x3f0   : > { %v3488_v33 = vunpack.i.h.bf16 %v3486_v32  ;;  %v3487_v34 = vunpack.i.l.bf16 %v3486_v32 }
 0x3f2   : > { %v1493_v35 = vpack.c.bf16 %v3488_v33, %v3487_v34 }
 0x3f3   : > { %v3496_v36 = vpop.permute.xlu0 %3495 }
 0x3f4   : > { %3102 = vmatpush3.bf16.msra.mxu0 %v1493_v35  ;;  %v3498_v43 = vunpack.i.h.bf16 %v3496_v36  ;;  %v3497_v44 = vunpack.i.l.bf16 %v3496_v36 }
 0x3f5   : > { %v3491_v39 = vpop.permute.xlu1 %3490  ;;  %3103 = vmatprep.subr.bf16.mxu0 %v3659_v42 }
 0x3f6   : > { %v3493_v40 = vunpack.i.h.bf16 %v3491_v39  ;;  %v3492_v41 = vunpack.i.l.bf16 %v3491_v39  ;;  %v1495_v47 = vpack.c.bf16 %v3498_v43, %v3497_v44 }
 0x3f7   : > { %v3506_v50 = vpop.permute.xlu0 %3505 }
 0x3f8   : > { %v1494_v45 = vpack.c.bf16 %v3493_v40, %v3492_v41  ;;  %v3508_v51 = vunpack.i.h.bf16 %v3506_v50  ;;  %v3507_v52 = vunpack.i.l.bf16 %v3506_v50 }
 0x3f9   : > { %v3501_v46 = vpop.permute.xlu1 %3500 }
 0x3fa   : > { %3104 = vmatpush3.bf16.msra.mxu0 %v1494_v45  ;;  %v3503_v48 = vunpack.i.h.bf16 %v3501_v46  ;;  %v3502_v49 = vunpack.i.l.bf16 %v3501_v46  ;;  %v1497_v53 = vpack.c.bf16 %v3508_v51, %v3507_v52 }
 0x3fb   : > { %3105 = vmatprep.subr.bf16.mxu0 %v3659_v42 }
 0x3fc   : > { %v1496_v21 = vpack.c.bf16 %v3503_v48, %v3502_v49 }
 0x3fd   : > { %v3511_v22 = vpop.permute.xlu1 %3510 }
 0x3fe   : > { %3106 = vmatpush3.bf16.msra.mxu0 %v1495_v47  ;;  %v3513_v25 = vunpack.i.h.bf16 %v3511_v22  ;;  %v3512_v54 = vunpack.i.l.bf16 %v3511_v22 }
 0x3ff   : > { %3107 = vmatprep.subr.bf16.mxu0 %v3659_v42 }
 0x400   : > { %v1498_v55 = vpack.c.bf16 %v3513_v25, %v3512_v54 }
 0x402   : > { %3108 = vmatpush3.bf16.msra.mxu0 %v1496_v21 }
 0x403   : > { %3109 = vmatprep.subr.bf16.mxu0 %v3659_v42 }
 0x406   : > { %3110 = vmatpush3.bf16.msra.mxu0 %v1497_v53 }
 0x407   : > { %3111 = vmatprep.subr.bf16.mxu0 %v3659_v42 }
 0x408   : > { %v1502_v57 = vpop.permute.xlu0 %1501 }
 0x40a   : > { %3112 = vmatpush3.bf16.msra.mxu0 %v1498_v55 }
 0x40d   : > { %3114 = vmatmul.mubr.bf16.vlgmr.msra.gmra.mrb[12].mxu0 %v3628_v56 }
 0x40e   : > { %v1507_v61 = vpop.permute.xlu1 %1506 }
 0x4e0   : > { %v1549_v58 = vpop.f32.mrb[12].mxu0 }
 0x4e1   : > { %v4059_v59 = vadd.f32 %v1549_v58, %v1502_v57  ;;  %v3115_v60 = vpop.f32.mrb[13].mxu0 }
 0x4e2   : > { %v1552_v62 = vpop.f32.mrb[14].mxu0 }
 0x4e3   : > { %v4061_v37 = vadd.f32 %v1552_v62, %v1507_v61  ;;  %v3116_v38 = vpop.f32.mrb[15].mxu0  ;;  %v1558_v63 = vmul.f32 0.1, %v4059_v59  ;;  %vm1556_vm14 = vcmp.ge.f32.partialorder %v4059_v59, 0.0 }
 0x4e5   : > { %vm1557_vm15 = vcmp.ge.f32.partialorder %v4061_v37, 0.0  ;;  %v1559_v0 = vmul.f32 0.1, %v4061_v37  ;;  %v1560_v1 = vsel %vm1556_vm14, %v4059_v59, %v1558_v63  ;;  %vm1880_vm14 = vcmask 48128  }
 0x4e7   : > { %v1561_v2 = vsel %vm1557_vm15, %v4061_v37, %v1559_v0  ;;  %vm1883_vm15 = vcmask 179200  }
 0x4e8   : > { %v3514_v3 = vpack.i.bf16 %v1561_v2, %v1560_v1 }
 0x4ea   : > { %3515 = vrot.lane.b32.xlu0 %v3514_v3, %s4466_s28  ;;  %s4507_s28 = sld [smem:[#allocation11_spill]] }
 0x4f0   : > { %v1772_v63 = vld [vmem:[%s4507_s28 + $0x8] sm:$0xff]  ;;  %v1771_v0 = vld [vmem:[%s4507_s28] sm:$0xff] }
 0x55c   : > { %v3516_v4 = vpop.permute.xlu0 %3515 }
 0x55d   : > { %v3518_v7 = vunpack.i.h.bf16 %v3516_v4  ;;  %v3517_v9 = vunpack.i.l.bf16 %v3516_v4 }
 0x55f   : > { %v1572_v10 = vsel %vm1570_vm1, 0.0, %v3518_v7  ;;  %v1571_v11 = vsel %vm1570_vm1, 0.0, %v3517_v9 }
 0x560   : > { %v1574_v12 = vsel %vm1442_vm11, %v1572_v10, 0.0  ;;  %v1573_v14 = vsel %vm1442_vm11, %v1571_v11, 0.0  ;;  %v2897_v15 = vpack.c.bf16 %v1572_v10, %v1571_v11 }
 0x561   : > { %v3524_v16 = vpack.i.bf16 %v1574_v12, %v1573_v14 }
 0x562   : > { %3118 = vmatpush3.bf16.msk.msra.mxu1 %vm4019_vm12, %v2897_v15 }
 0x563   : > { %3525 = vrot.lane.b32.xlu0 %v3524_v16, %s4474_s27  ;;  %3520 = vrot.lane.b32.xlu1 %v3524_v16, %s4471_s8 }
 0x564   : > { %3119 = vmatprep.subr.bf16.mxu1 %v3659_v42 }
 0x567   : > { %1603 = vperm.xlu0 %3473, %v1578_v17   ;;  %1598 = vperm.xlu1 %3472, %v1577_v18  }
 0x56b   : > { %3535 = vrot.lane.b32.xlu0 %v3514_v3, %s4468_s1  ;;  %s4473_s1 = smov 6  }
 0x5d5   : > { %v3526_v13 = vpop.permute.xlu0 %3525  ;;  %v3521_v19 = vpop.permute.xlu1 %3520 }
 0x5d6   : > { %v3523_v20 = vunpack.i.h.bf16 %v3521_v19  ;;  %v3522_v23 = vunpack.i.l.bf16 %v3521_v19  ;;  %v3528_v24 = vunpack.i.h.bf16 %v3526_v13  ;;  %v3527_v26 = vunpack.i.l.bf16 %v3526_v13 }
 0x5d8   : > { %v1594_v27 = vpack.c.bf16 %v3523_v20, %v3522_v23  ;;  %v1595_v28 = vpack.c.bf16 %v3528_v24, %v3527_v26 }
 0x5da   : > { %3120 = vmatpush3.bf16.msra.mxu1 %v1594_v27 }
 0x5db   : > { %3121 = vmatprep.subr.bf16.mxu1 %v3659_v42 }
 0x5de   : > { %3122 = vmatpush3.bf16.msra.mxu1 %v1595_v28 }
 0x5df   : > { %3127 = vmatprep.subr.bf16.mxu1 %v3659_v42 }
 0x5e1   : > { %3124 = vmatmul.mubr.msk.bf16.vlgmr.msra.gmra.mrb[12].mxu1 %vm1149_vm3, %v3629_v29 }
 0x5e2   : > { %3133 = vmatprep.mubr.msk.bf16.mxu1 %vm3661_vm13, %v3659_v42 }
 0x5e6   : > { %v1604_v30 = vpop.permute.xlu0 %1603  ;;  %v1599_v39 = vpop.permute.xlu1 %1598 }
 0x5ea   : > { %v3536_v31 = vpop.permute.xlu0 %3535 }
 0x5eb   : > { %v3538_v32 = vunpack.i.h.bf16 %v3536_v31  ;;  %v3537_v33 = vunpack.i.l.bf16 %v3536_v31 }
 0x5ed   : > { %v4095_v34 = vsel %vm1437_vm10, 0.0, %v3538_v32  ;;  %v4098_v35 = vsel %vm1437_vm10, 0.0, %v3537_v33  ;;  %v3631_v32 = vld [vmem:[%s4509_s10] sm:$0xff]   ;;  %s4516_s10 = smov 122  }
 0x5ee   : > { %v2907_v36 = vpack.c.bf16 %v4095_v34, %v4098_v35  ;;  %v1768_v61 = vsel %vm1766_vm7, %v4095_v34, 0.0  ;;  %v1767_v62 = vsel %vm1766_vm7, %v4098_v35, 0.0  ;;  %vm1997_vm7 = vcmask 130048  }
 0x5ef   : > { %v3554_v38 = vpack.i.bf16 %v1768_v61, %v1767_v62  ;;  %v1888_v61 = vld [vmem:[%s4438_s11] sm:$0xff] }
 0x6b4   : > { %v1648_v40 = vpop.f32.mrb[12].mxu1 }
 0x6b5   : > { %v1649_v41 = vadd.f32 %v1648_v40, %v1599_v39  ;;  %v3125_v43 = vpop.f32.mrb[13].mxu1 }
 0x6b6   : > { %v1651_v44 = vpop.f32.mrb[14].mxu1 }
 0x6b7   : > { %v4103_v45 = vadd.f32 %v1649_v41, %v4059_v59  ;;  %v1652_v46 = vadd.f32 %v1651_v44, %v1604_v30  ;;  %v3126_v47 = vpop.f32.mrb[15].mxu1 }
 0x6b9   : > { %v4106_v48 = vadd.f32 %v1652_v46, %v4061_v37  ;;  %v1659_v49 = vmul.f32 0.1, %v4103_v45  ;;  %vm1657_vm2 = vcmp.ge.f32.partialorder %v4103_v45, 0.0 }
 0x6bb   : > { %vm1658_vm5 = vcmp.ge.f32.partialorder %v4106_v48, 0.0  ;;  %v1660_v50 = vmul.f32 0.1, %v4106_v48  ;;  %v1661_v51 = vsel %vm1657_vm2, %v4103_v45, %v1659_v49  ;;  %vm2911_vm2 = vmpackc.low %vm1883_vm15, %vm1883_vm15 }
 0x6bd   : > { %v1662_v52 = vsel %vm1658_vm5, %v4106_v48, %v1660_v50 }
 0x6be   : > { %v3529_v21 = vpack.i.bf16 %v1662_v52, %v1661_v51 }
 0x6c0   : > { %3530 = vrot.lane.b32.xlu1 %v3529_v21, %s4505_s3 }
 0x732   : > { %v3531_v22 = vpop.permute.xlu1 %3530 }
 0x733   : > { %v3533_v53 = vunpack.i.h.bf16 %v3531_v22  ;;  %v3532_v25 = vunpack.i.l.bf16 %v3531_v22 }
 0x735   : > { %v1672_v54 = vsel %vm816_vm0, 0.0, %v3533_v53  ;;  %v1671_v55 = vsel %vm816_vm0, 0.0, %v3532_v25 }
 0x736   : > { %v1675_v56 = vsel %vm1673_vm6, %v1672_v54, 0.0  ;;  %v1674_v57 = vsel %vm1673_vm6, %v1671_v55, 0.0  ;;  %v2902_v58 = vpack.c.bf16 %v1672_v54, %v1671_v55 }
 0x737   : > { %v3544_v60 = vpack.i.bf16 %v1675_v56, %v1674_v57 }
 0x738   : > { %3128 = vmatpush3.bf16.msk.msra.mxu1 %vm2901_vm8, %v2902_v58 }
 0x739   : > { %3545 = vrot.lane.b32.xlu0 %v3544_v60, %s4477_s30  ;;  %3540 = vrot.lane.b32.xlu1 %v3544_v60, %s4501_s4  ;;  %v1889_v60 = vld [vmem:[%s4438_s11 + $0x8] sm:$0xff] }
 0x73a   : > { %3129 = vmatprep.subr.bf16.mxu1 %v3659_v42 }
 0x73d   : > { %3555 = vrot.lane.b32.xlu0 %v3554_v38, %s4474_s27  ;;  %3550 = vrot.lane.b32.xlu1 %v3554_v38, %s4471_s8  ;;  %s4508_s8 = sld [smem:[#allocation10_spill]]  ;;  %s4511_s27 = smov 2  }
 0x741   : > { %3565 = vrot.lane.b32.xlu0 %v3554_v38, %s4506_s9  ;;  %3560 = vrot.lane.b32.xlu1 %v3554_v38, %s4501_s4 }
 0x743   : > { %v3630_v14 = vld [vmem:[%s4508_s8] sm:$0xff]  }
 0x745   : > { %1811 = vperm.xlu0 %3473, %v1772_v63   ;;  %1806 = vperm.xlu1 %3472, %v1771_v0  }
 0x7ab   : > { %v3546_v1 = vpop.permute.xlu0 %3545  ;;  %v3541_v2 = vpop.permute.xlu1 %3540 }
 0x7ac   : > { %v3543_v3 = vunpack.i.h.bf16 %v3541_v2  ;;  %v3542_v4 = vunpack.i.l.bf16 %v3541_v2  ;;  %v3548_v7 = vunpack.i.h.bf16 %v3546_v1  ;;  %v3547_v9 = vunpack.i.l.bf16 %v3546_v1 }
 0x7ae   : > { %v1695_v10 = vpack.c.bf16 %v3543_v3, %v3542_v4  ;;  %v1696_v11 = vpack.c.bf16 %v3548_v7, %v3547_v9 }
 0x7af   : > { %v3551_v12 = vpop.permute.xlu1 %3550  ;;  %v3556_v17 = vpop.permute.xlu0 %3555 }
 0x7b0   : > { %3130 = vmatpush3.bf16.msra.mxu1 %v1695_v10  ;;  %v3553_v15 = vunpack.i.h.bf16 %v3551_v12  ;;  %v3552_v16 = vunpack.i.l.bf16 %v3551_v12  ;;  %v3558_v18 = vunpack.i.h.bf16 %v3556_v17  ;;  %v3557_v13 = vunpack.i.l.bf16 %v3556_v17  ;;  %v3632_v17 = vld [vmem:[%s4439_s12] sm:$0xff]  }
 0x7b1   : > { %3131 = vmatprep.subr.bf16.mxu1 %v3659_v42 }
 0x7b2   : > { %v1800_v19 = vpack.c.bf16 %v3553_v15, %v3552_v16  ;;  %v1801_v23 = vpack.c.bf16 %v3558_v18, %v3557_v13  ;;  %v1992_v18 = vadd.s32 8, %v3993_v5 }
 0x7b3   : > { %v3561_v20 = vpop.permute.xlu1 %3560  ;;  %v3566_v27 = vpop.permute.xlu0 %3565 }
 0x7b4   : > { %3132 = vmatpush3.bf16.msra.mxu1 %v1696_v11  ;;  %v3563_v24 = vunpack.i.h.bf16 %v3561_v20  ;;  %v3562_v26 = vunpack.i.l.bf16 %v3561_v20  ;;  %v3568_v28 = vunpack.i.h.bf16 %v3566_v27  ;;  %v3567_v29 = vunpack.i.l.bf16 %v3566_v27 }
 0x7b5   : > { %3137 = vmatprep.subr.bf16.mxu1 %v3659_v42  ;;  %v1993_v13 = vmul.u32 2, %v1992_v18 }
 0x7b6   : > { %v1802_v30 = vpack.c.bf16 %v3563_v24, %v3562_v26  ;;  %v1803_v31 = vpack.c.bf16 %v3568_v28, %v3567_v29 }
 0x7b7   : > { %3134 = vmatmul.mubr.msk.bf16.vlgmr.msra.gmra.mrb[16].mxu1 %vm1149_vm3, %v3630_v14  ;;  %vm1819_vm3 = vcmask 654336   ;;  %vm1994_vm5 = vcmp.eq.s32.totalorder %v3995_v6, %v1993_v13 }
 0x7b8   : > { %3138 = vmatpush3.bf16.msk.msra.mxu1 %vm2906_vm9, %v2907_v36  ;;  %3147 = vmatprep.mubr.msk.bf16.mxu1 %vm3661_vm13, %v3659_v42  ;;  %vm3232_vm6 = vmpackc.low %vm1994_vm5, %vm3999_vm4  ;;  %vm2089_vm9 = vcmask 269312   ;;  %vm2196_vm5 = vcmask 1043456  }
 0x7b9   : > { %3139 = vmatprep.subr.bf16.mxu1 %v3659_v42 }
 0x7bc   : > { %3140 = vmatpush3.bf16.msra.mxu1 %v1800_v19  ;;  %v3666_v19 = vmov 1.0|1.0  }
 0x7bd   : > { %3141 = vmatprep.subr.bf16.mxu1 %v3659_v42  ;;  %3233 = vmatprep.subr.msk.bf16.mxu0 %vm3232_vm6, %v3666_v19 }
 0x7be   : > { %3235 = vmatpush3.bf16.msk.msra.mxu0 %vm3232_vm6, %v3666_v19  ;;  %v2321_v19 = vld [vmem:[%s4444_s17] sm:$0xff] }
 0x7bf   : > { %3172 = vmatprep.subr.bf16.mxu0 %v3659_v42 }
 0x7c0   : > { %3142 = vmatpush3.bf16.msra.mxu1 %v1801_v23 }
 0x7c1   : > { %3143 = vmatprep.subr.bf16.mxu1 %v3659_v42 }
 0x7c4   : > { %3144 = vmatpush3.bf16.msra.mxu1 %v1802_v30  ;;  %v1807_v33 = vpop.permute.xlu1 %1806  ;;  %v1812_v39 = vpop.permute.xlu0 %1811 }
 0x7c5   : > { %3145 = vmatprep.subr.bf16.mxu1 %v3659_v42 }
 0x7c8   : > { %3146 = vmatpush3.bf16.msra.mxu1 %v1803_v31 }
 0x7c9   : > { %3151 = vmatprep.subr.bf16.mxu1 %v3659_v42 }
 0x7cb   : > { %3148 = vmatmul.mubr.msk.bf16.vlgmr.msra.gmra.mrb[20].mxu1 %vm1819_vm3, %v3631_v32 }
 0x7cc   : > { %3161 = vmatprep.mubr.msk.bf16.mxu1 %vm3661_vm13, %v3659_v42 }
 0x89e   : > { %v1857_v34 = vpop.f32.mrb[20].mxu1 }
 0x89f   : > { %v1858_v35 = vadd.f32 %v1857_v34, %v1807_v33  ;;  %v3149_v36 = vpop.f32.mrb[21].mxu1 }
 0x8a0   : > { %v1860_v40 = vpop.f32.mrb[22].mxu1 }
 0x8a1   : > { %v4159_v41 = vadd.f32 %v1858_v35, %v4059_v59  ;;  %v1861_v43 = vadd.f32 %v1860_v40, %v1812_v39  ;;  %v3150_v44 = vpop.f32.mrb[23].mxu1 }
 0x8a3   : > { %v4162_v46 = vadd.f32 %v1861_v43, %v4061_v37  ;;  %v1868_v47 = vmul.f32 0.1, %v4159_v41  ;;  %vm1866_vm11 = vcmp.ge.f32.partialorder %v4159_v41, 0.0 }
 0x8a5   : > { %vm1867_vm12 = vcmp.ge.f32.partialorder %v4162_v46, 0.0  ;;  %v1869_v49 = vmul.f32 0.1, %v4162_v46  ;;  %v1870_v50 = vsel %vm1866_vm11, %v4159_v41, %v1868_v47  ;;  %vm2123_vm11 = vcmask 523264  }
 0x8a7   : > { %v1871_v51 = vsel %vm1867_vm12, %v4162_v46, %v1869_v49 }
 0x8a8   : > { %v3569_v52 = vpack.i.bf16 %v1871_v51, %v1870_v50 }
 0x8aa   : > { %3570 = vrot.lane.b32.xlu1 %v3569_v52, %s4473_s1  ;;  %s4510_s1 = sld [smem:[#allocation9_spill]] }
 0x8b0   : > { %v1679_v57 = vld [vmem:[%s4510_s1 + $0x8] sm:$0xff]  ;;  %v1678_v58 = vld [vmem:[%s4510_s1] sm:$0xff] }
 0x91c   : > { %v3571_v59 = vpop.permute.xlu1 %3570 }
 0x91d   : > { %v3573_v37 = vunpack.i.h.bf16 %v3571_v59  ;;  %v3572_v21 = vunpack.i.l.bf16 %v3571_v59 }
 0x91f   : > { %v1882_v22 = vsel %vm1880_vm14, 0.0, %v3573_v37  ;;  %v1881_v53 = vsel %vm1880_vm14, 0.0, %v3572_v21 }
 0x920   : > { %v1885_v25 = vsel %vm1883_vm15, %v1882_v22, 0.0  ;;  %v1884_v54 = vsel %vm1883_vm15, %v1881_v53, 0.0  ;;  %v2912_v55 = vpack.c.bf16 %v1882_v22, %v1881_v53  ;;  %v2093_v53 = vld [vmem:[%s4450_s23] sm:$0xff]  ;;  %vm2318_vm15 = vcmask 277504  }
 0x921   : > { %v3579_v56 = vpack.i.bf16 %v1885_v25, %v1884_v54 }
 0x922   : > { %3152 = vmatpush3.bf16.msk.msra.mxu1 %vm2911_vm2, %v2912_v55 }
 0x923   : > { %3580 = vrot.lane.b32.xlu1 %v3579_v56, %s4477_s30  ;;  %3575 = vrot.lane.b32.xlu0 %v3579_v56, %s4501_s4  ;;  %s4513_s30 = smov 127  }
 0x924   : > { %3153 = vmatprep.subr.bf16.mxu1 %v3659_v42 }
 0x927   : > { %3590 = vrot.lane.b32.xlu1 %v3579_v56, %s3664_s26  ;;  %3585 = vrot.lane.b32.xlu0 %v3579_v56, %s3665_s7 }
 0x92b   : > { %1704 = vperm.xlu1 %3472, %v1679_v57   ;;  %1699 = vperm.xlu0 %3473, %v1678_v58  }
 0x92f   : > { %1928 = vperm.xlu1 %3472, %v1889_v60   ;;  %1923 = vperm.xlu0 %3473, %v1888_v61  }
 0x995   : > { %v3581_v62 = vpop.permute.xlu1 %3580  ;;  %v3576_v38 = vpop.permute.xlu0 %3575 }
 0x996   : > { %v3578_v63 = vunpack.i.h.bf16 %v3576_v38  ;;  %v3577_v0 = vunpack.i.l.bf16 %v3576_v38  ;;  %v3583_v1 = vunpack.i.h.bf16 %v3581_v62  ;;  %v3582_v2 = vunpack.i.l.bf16 %v3581_v62 }
 0x998   : > { %v1917_v3 = vpack.c.bf16 %v3578_v63, %v3577_v0  ;;  %v1918_v7 = vpack.c.bf16 %v3583_v1, %v3582_v2  ;;  %v2092_v1 = vld [vmem:[%s4451_s24] sm:$0xf] }
 0x999   : > { %v3586_v4 = vpop.permute.xlu0 %3585  ;;  %v3591_v11 = vpop.permute.xlu1 %3590 }
 0x99a   : > { %3154 = vmatpush3.bf16.msra.mxu1 %v1917_v3  ;;  %v3588_v9 = vunpack.i.h.bf16 %v3586_v4  ;;  %v3587_v10 = vunpack.i.l.bf16 %v3586_v4  ;;  %v3593_v12 = vunpack.i.h.bf16 %v3591_v11  ;;  %v3592_v14 = vunpack.i.l.bf16 %v3591_v11 }
 0x99b   : > { %3155 = vmatprep.subr.bf16.mxu1 %v3659_v42 }
 0x99c   : > { %v1919_v15 = vpack.c.bf16 %v3588_v9, %v3587_v10  ;;  %v1920_v16 = vpack.c.bf16 %v3593_v12, %v3592_v14 }
 0x99e   : > { %3156 = vmatpush3.bf16.msra.mxu1 %v1918_v7 }
 0x99f   : > { %3157 = vmatprep.subr.bf16.mxu1 %v3659_v42 }
 0x9a2   : > { %3158 = vmatpush3.bf16.msra.mxu1 %v1919_v15 }
 0x9a3   : > { %3159 = vmatprep.subr.bf16.mxu1 %v3659_v42 }
 0x9a6   : > { %3160 = vmatpush3.bf16.msra.mxu1 %v1920_v16 }
 0x9a7   : > { %3200 = vmatprep.subr.bf16.mxu1 %v3659_v42 }
 0x9a9   : > { %3162 = vmatmul.mubr.msk.bf16.vlgmr.msra.gmra.mrb[16].mxu1 %vm1819_vm3, %v3632_v17  ;;  %vm2920_vm3 = vmpackc.low %vm2089_vm9, %vm2089_vm9 }
 0x9aa   : > { %3206 = vmatprep.mubr.msk.bf16.mxu1 %vm3661_vm13, %v3659_v42  ;;  %v1700_v20 = vpop.permute.xlu0 %1699  ;;  %v1705_v23 = vpop.permute.xlu1 %1704 }
 0x9ab   : > { %v3236_v24 = vadd.f32 %v1700_v20, %v4103_v45  ;;  %v3240_v26 = vadd.f32 %v1705_v23, %v4106_v48  ;;  %v2177_v20 = vld [vmem:[%s4440_s13] sm:$0xff] }
 0x9ad   : > { %v3237_v27 = vadd.f32 %v3236_v24, %v4159_v41  ;;  %v3241_v28 = vadd.f32 %v3240_v26, %v4162_v46 }
 0x9ae   : > { %v1924_v5 = vpop.permute.xlu0 %1923  ;;  %v1929_v6 = vpop.permute.xlu1 %1928 }
 0x9af   : > { %v3238_v29 = vadd.f32 %v3237_v27, %v1924_v5  ;;  %v3242_v30 = vadd.f32 %v3241_v28, %v1929_v6 }
 0xa7c   : > { %v1973_v8 = vpop.f32.mrb[16].mxu1 }
 0xa7d   : > { %v3239_v31 = vadd.f32 %v3238_v29, %v1973_v8  ;;  %v3163_v32 = vpop.f32.mrb[17].mxu1  ;;  %v2176_v8 = vld [vmem:[%s4441_s14] sm:$0xf] }
 0xa7e   : > { %v1976_v33 = vpop.f32.mrb[18].mxu1 }
 0xa7f   : > { %v1984_v34 = vmul.f32 0.5, %v3239_v31  ;;  %v3243_v35 = vadd.f32 %v3242_v30, %v1976_v33  ;;  %v3164_v36 = vpop.f32.mrb[19].mxu1 }
 0xa81   : > { %vm1986_vm4 = vcmp.ge.f32.partialorder %v1984_v34, 0.0  ;;  %v1988_v39 = vmul.f32 0.1, %v1984_v34  ;;  %v1985_v45 = vmul.f32 0.5, %v3243_v35  ;;  %v2320_v35 = vld [vmem:[%s4445_s18] sm:$0xf] }
 0xa83   : > { %vm1987_vm8 = vcmp.ge.f32.partialorder %v1985_v45, 0.0  ;;  %v1989_v48 = vmul.f32 0.1, %v1985_v45  ;;  %v1990_v40 = vsel %vm1986_vm4, %v1984_v34, %v1988_v39  ;;  %vm2192_vm4 = vcmask 195584  }
 0xa84   : > { %3169 = vmatprep.mubr.msk.f32.mxu0 %vm1997_vm7, %v1990_v40 }
 0xa85   : > { %v1991_v41 = vsel %vm1987_vm8, %v1985_v45, %v1989_v48 }
 0xa86   : > { %3170 = vmatmul.mubr.msk.f32.vlgmr.msra.gmra.mrb[16].mxu0 %vm1997_vm7, %v1991_v41  ;;  %vm2343_vm7 = vcmask 326656  }
 0xa87   : > { %3180 = vmatprep.mubr.msk.bf16.mxu0 %vm3661_vm13, %v3659_v42 }
 0xb59   : > { %v3171_v43 = vpop.f32.mrb[16].mxu0 }
 0xb5a   : > { %v2070_v44 = vpop.f32.mrb[17].mxu0 }
 0xb5b   : > { %v3594_v46 = vpack.i.bf16 %v3171_v43, %v2070_v44 }
 0xb5d   : > { %3595 = vrot.lane.b32.xlu0 %v3594_v46, %s4511_s27 }
 0xbcf   : > { %v3596_v47 = vpop.permute.xlu0 %3595 }
 0xbd0   : > { %v3598_v49 = vunpack.i.h.bf16 %v3596_v47  ;;  %v3597_v50 = vunpack.i.l.bf16 %v3596_v47 }
 0xbd2   : > { %v2088_v51 = vsel %vm1437_vm10, 0.0, %v3598_v49  ;;  %v2087_v52 = vsel %vm1437_vm10, 0.0, %v3597_v50 }
 0xbd3   : > { %v2091_v59 = vsel %vm2089_vm9, %v2088_v51, 0.0  ;;  %v2090_v37 = vsel %vm2089_vm9, %v2087_v52, 0.0  ;;  %v2921_v21 = vpack.c.bf16 %v2088_v51, %v2087_v52 }
 0xbd4   : > { %v3604_v22 = vpack.i.bf16 %v2091_v59, %v2090_v37 }
 0xbd5   : > { %3173 = vmatpush3.bf16.msk.msra.mxu0 %vm2920_vm3, %v2921_v21 }
 0xbd6   : > { %3605 = vrot.lane.b32.xlu0 %v3604_v22, %s4512_s6  ;;  %3600 = vrot.lane.b32.xlu1 %v3604_v22, %s4513_s30 }
 0xbd7   : > { %3174 = vmatprep.subr.bf16.mxu0 %v3659_v42 }
 0xbda   : > { %2120 = vperm.xlu0 %3473, %v2093_v53   ;;  %3610 = vrot.lane.b32.xlu1 %v3604_v22, %s4501_s4 }
 0xc48   : > { %v3606_v25 = vpop.permute.xlu0 %3605  ;;  %v3601_v54 = vpop.permute.xlu1 %3600 }
 0xc49   : > { %v3603_v55 = vunpack.i.h.bf16 %v3601_v54  ;;  %v3602_v56 = vunpack.i.l.bf16 %v3601_v54  ;;  %v3608_v57 = vunpack.i.h.bf16 %v3606_v25  ;;  %v3607_v58 = vunpack.i.l.bf16 %v3606_v25 }
 0xc4b   : > { %v2115_v60 = vpack.c.bf16 %v3603_v55, %v3602_v56  ;;  %v2116_v62 = vpack.c.bf16 %v3608_v57, %v3607_v58  ;;  %v2402_v58 = vld [vmem:[%s4446_s19] sm:$0xff] }
 0xc4c   : > { %v3611_v61 = vpop.permute.xlu1 %3610 }
 0xc4d   : > { %3175 = vmatpush3.bf16.msra.mxu0 %v2115_v60  ;;  %v3613_v38 = vunpack.i.h.bf16 %v3611_v61  ;;  %v3612_v63 = vunpack.i.l.bf16 %v3611_v61  ;;  %v2252_v60 = vld [vmem:[%s4442_s15] sm:$0xff] }
 0xc4e   : > { %3176 = vmatprep.subr.bf16.mxu0 %v3659_v42 }
 0xc4f   : > { %v2117_v0 = vpack.c.bf16 %v3613_v38, %v3612_v63 }
 0xc51   : > { %3177 = vmatpush3.bf16.msra.mxu0 %v2116_v62 }
 0xc52   : > { %3178 = vmatprep.subr.bf16.mxu0 %v3659_v42 }
 0xc55   : > { %3179 = vmatpush3.bf16.msra.mxu0 %v2117_v0 }
 0xc56   : > { %3184 = vmatprep.subr.bf16.mxu0 %v3659_v42 }
 0xc58   : > { %3181 = vmatmul.mubr.msk.bf16.vlgmr.msra.gmra.mrb[20].mxu0 %vm2123_vm11, %v2092_v1  ;;  %vm2249_vm11 = vcmask 285696   ;;  %v2251_v1 = vld [vmem:[%s4443_s16] sm:$0xf] }
 0xc59   : > { %3188 = vmatprep.mubr.msk.bf16.mxu0 %vm3661_vm13, %v3659_v42  ;;  %v2121_v2 = vpop.permute.xlu0 %2120 }
 0xd2b   : > { %v2161_v3 = vpop.f32.mrb[20].mxu0 }
 0xd2c   : > { %v4233_v4 = vadd.f32 %v2161_v3, %v2121_v2  ;;  %v3182_v7 = vpop.f32.mrb[21].mxu0 }
 0xd2d   : > { %v2164_v9 = vpop.f32.mrb[22].mxu0 }
 0xd2e   : > { %v3183_v10 = vpop.f32.mrb[23].mxu0  ;;  %vm2167_vm12 = vcmp.ge.f32.partialorder %v4233_v4, 0.0  ;;  %v2168_v11 = vmul.f32 0.1, %v4233_v4 }
 0xd30   : > { %v2169_v12 = vsel %vm2167_vm12, %v4233_v4, %v2168_v11  ;;  %vm2399_vm12 = vcmask 310272  }
 0xd31   : > { %2314 = vrot.lane.b32.xlu0 %v2169_v12, %s4511_s27  ;;  %2171 = vrot.lane.b32.xlu1 %v2169_v12, %s4514_s21 }
 0xda3   : > { %v2315_v14 = vpop.permute.xlu0 %2314  ;;  %v2172_v15 = vpop.permute.xlu1 %2171 }
 0xda4   : > { %v2174_v16 = vsel %vm1570_vm1, 0.0, %v2172_v15  ;;  %v2317_v18 = vsel %vm1437_vm10, 0.0, %v2315_v14  ;;  %vm3667_vm10 = vmmov 1   ;;  %v2401_v14 = vld [vmem:[%s4447_s20] sm:$0xf] }
 0xda5   : > { %v2175_v17 = vsel %vm2089_vm9, %v2174_v16, 0.0  ;;  %v2319_v13 = vsel %vm2318_vm15, %v2317_v18, 0.0  ;;  %vm2924_vm2 = vmpackc.low %vm3667_vm10, %vm2089_vm9 }
 0xda6   : > { %2182 = vrot.lane.b32.xlu0 %v2175_v17, %s4512_s6  ;;  %2179 = vrot.lane.b32.xlu1 %v2175_v17, %s4513_s30  ;;  %vm2932_vm6 = vmpackc.low %vm3667_vm10, %vm2318_vm15 }
 0xda7   : > { %vm2936_vm15 = vmpackc.low %vm3667_vm10, %vm2399_vm12 }
 0xdaa   : > { %2326 = vrot.lane.b32.xlu0 %v2319_v13, %s4512_s6  ;;  %2323 = vrot.lane.b32.xlu1 %v2319_v13, %s4513_s30 }
 0xdae   : > { %2332 = vrot.lane.b32.xlu0 %v2319_v13, %s4506_s9  ;;  %2329 = vrot.lane.b32.xlu1 %v2319_v13, %s4501_s4 }
 0xdb2   : > { %2340 = vperm.xlu0 %3473, %v2321_v19   ;;  %2189 = vperm.xlu1 %3472, %v2177_v20  }
 0xe18   : > { %v2183_v23 = vpop.permute.xlu0 %2182  ;;  %v2180_v24 = vpop.permute.xlu1 %2179 }
 0xe19   : > { %v2925_v26 = vpack.c.bf16 %v2180_v24, %v2174_v16  ;;  %v2186_v27 = vpack.c.bf16 %v2183_v23, %v2183_v23 }
 0xe1b   : > { %3185 = vmatpush3.bf16.msk.msra.mxu0 %vm2924_vm2, %v2925_v26  ;;  %v2198_v29 = vsel %vm2196_vm5, %v2186_v27, 0  ;;  %vm2489_vm2 = vcmask 293888  }
 0xe1c   : > { %v2327_v5 = vpop.permute.xlu0 %2326  ;;  %v2324_v28 = vpop.permute.xlu1 %2323  ;;  %3186 = vmatprep.subr.bf16.mxu0 %v3659_v42 }
 0xe1d   : > { %v2933_v6 = vpack.c.bf16 %v2324_v28, %v2317_v18 }
 0xe1f   : > { %3187 = vmatpush3.bf16.msra.mxu0 %v2198_v29  ;;  %3201 = vmatpush3.bf16.msk.msra.mxu1 %vm2932_vm6, %v2933_v6 }
 0xe20   : > { %v2333_v30 = vpop.permute.xlu0 %2332  ;;  %v2330_v31 = vpop.permute.xlu1 %2329  ;;  %3202 = vmatprep.subr.bf16.mxu1 %v3659_v42  ;;  %3192 = vmatprep.subr.bf16.mxu0 %v3659_v42 }
 0xe21   : > { %v2336_v32 = vpack.c.bf16 %v2330_v31, %v2327_v5  ;;  %v2337_v33 = vpack.c.bf16 %v2333_v30, %v2333_v30 }
 0xe22   : > { %3189 = vmatmul.mubr.msk.bf16.vlgmr.msra.gmra.mrb[24].mxu0 %vm2192_vm4, %v2176_v8 }
 0xe23   : > { %3203 = vmatpush3.bf16.msra.mxu1 %v2336_v32  ;;  %3196 = vmatprep.mubr.msk.bf16.mxu0 %vm3661_vm13, %v3659_v42  ;;  %v2348_v34 = vsel %vm2196_vm5, %v2337_v33, 0 }
 0xe24   : > { %3204 = vmatprep.subr.bf16.mxu1 %v3659_v42 }
 0xe27   : > { %3205 = vmatpush3.bf16.msra.mxu1 %v2348_v34 }
 0xe28   : > { %3220 = vmatprep.subr.bf16.mxu1 %v3659_v42 }
 0xe2a   : > { %3207 = vmatmul.mubr.msk.bf16.vlgmr.msra.gmra.mrb[24].mxu1 %vm2343_vm7, %v2320_v35 }
 0xe2b   : > { %3228 = vmatprep.mubr.msk.bf16.mxu1 %vm3661_vm13, %v3659_v42 }
 0xe31   : > { %v2190_v36 = vpop.permute.xlu1 %2189  ;;  %v2341_v47 = vpop.permute.xlu0 %2340 }
 0xef5   : > { %v2234_v39 = vpop.f32.mrb[24].mxu0 }
 0xef6   : > { %v2235_v45 = vadd.f32 %v2234_v39, %v2190_v36  ;;  %v3190_v48 = vpop.f32.mrb[25].mxu0 }
 0xef7   : > { %v2237_v40 = vpop.f32.mrb[26].mxu0 }
 0xef8   : > { %v4280_v41 = vadd.f32 %v2235_v45, %v4233_v4  ;;  %v3191_v43 = vpop.f32.mrb[27].mxu0 }
 0xefa   : > { %vm2241_vm8 = vcmp.ge.f32.partialorder %v4280_v41, 0.0  ;;  %v2242_v44 = vmul.f32 0.1, %v4280_v41 }
 0xefc   : > { %v2243_v46 = vsel %vm2241_vm8, %v4280_v41, %v2242_v44 }
 0xefd   : > { %v2384_v49 = vpop.f32.mrb[24].mxu1  ;;  %2245 = vrot.lane.b32.xlu1 %v2243_v46, %s4505_s3 }
 0xefe   : > { %v2385_v50 = vadd.f32 %v2384_v49, %v2341_v47  ;;  %v3208_v51 = vpop.f32.mrb[25].mxu1 }
 0xeff   : > { %v2387_v52 = vpop.f32.mrb[26].mxu1 }
 0xf00   : > { %v2390_v59 = vadd.f32 %v2385_v50, %v4233_v4  ;;  %v3209_v37 = vpop.f32.mrb[27].mxu1 }
 0xf02   : > { %vm2391_vm3 = vcmp.ge.f32.partialorder %v2390_v59, 0.0  ;;  %v2392_v21 = vmul.f32 0.1, %v2390_v59 }
 0xf04   : > { %v2393_v22 = vsel %vm2391_vm3, %v2390_v59, %v2392_v21 }
 0xf05   : > { %2395 = vrot.lane.b32.xlu0 %v2393_v22, %s4515_s0 }
 0xf6f   : > { %v2246_v53 = vpop.permute.xlu1 %2245 }
 0xf70   : > { %v2248_v25 = vsel %vm816_vm0, 0.0, %v2246_v53 }
 0xf71   : > { %v2250_v54 = vsel %vm2249_vm11, %v2248_v25, 0.0 }
 0xf72   : > { %2257 = vrot.lane.b32.xlu0 %v2250_v54, %s4516_s10  ;;  %2254 = vrot.lane.b32.xlu1 %v2250_v54, %s4501_s4 }
 0xf77   : > { %v2396_v55 = vpop.permute.xlu0 %2395 }
 0xf78   : > { %v2398_v56 = vsel %vm1880_vm14, 0.0, %v2396_v55  ;;  %vm2928_vm14 = vmpackc.low %vm3667_vm10, %vm2249_vm11 }
 0xf79   : > { %v2400_v57 = vsel %vm2399_vm12, %v2398_v56, 0.0 }
 0xf7a   : > { %2407 = vrot.lane.b32.xlu0 %v2400_v57, %s4516_s10  ;;  %2404 = vrot.lane.b32.xlu1 %v2400_v57, %s4501_s4 }
 0xf7e   : > { %2413 = vrot.lane.b32.xlu0 %v2400_v57, %s3664_s26  ;;  %2410 = vrot.lane.b32.xlu1 %v2400_v57, %s3665_s7 }
 0xf82   : > { %2421 = vperm.xlu0 %3473, %v2402_v58   ;;  %2264 = vperm.xlu1 %3472, %v2252_v60  }
 0xfe4   : > { %v2258_v61 = vpop.permute.xlu0 %2257  ;;  %v2255_v62 = vpop.permute.xlu1 %2254 }
 0xfe5   : > { %v2929_v38 = vpack.c.bf16 %v2255_v62, %v2248_v25  ;;  %v2261_v63 = vpack.c.bf16 %v2258_v61, %v2258_v61 }
 0xfe7   : > { %3193 = vmatpush3.bf16.msk.msra.mxu0 %vm2928_vm14, %v2929_v38  ;;  %v2271_v0 = vsel %vm2196_vm5, %v2261_v63, 0 }
 0xfe8   : > { %3194 = vmatprep.subr.bf16.mxu0 %v3659_v42 }
 0xfeb   : > { %3195 = vmatpush3.bf16.msra.mxu0 %v2271_v0 }
 0xfec   : > { %v2408_v2 = vpop.permute.xlu0 %2407  ;;  %v2405_v3 = vpop.permute.xlu1 %2404  ;;  %3210 = vmatprep.subr.bf16.mxu0 %v3659_v42 }
 0xfed   : > { %v2937_v4 = vpack.c.bf16 %v2405_v3, %v2398_v56 }
 0xfee   : > { %3197 = vmatmul.mubr.msk.bf16.vlgmr.msra.gmra.mrb[28].mxu0 %vm2192_vm4, %v2251_v1 }
 0xfef   : > { %3211 = vmatpush3.bf16.msk.msra.mxu0 %vm2936_vm15, %v2937_v4  ;;  %3216 = vmatprep.mubr.msk.bf16.mxu0 %vm3661_vm13, %v3659_v42 }
 0xff0   : > { %v2414_v7 = vpop.permute.xlu0 %2413  ;;  %v2411_v9 = vpop.permute.xlu1 %2410  ;;  %3212 = vmatprep.subr.bf16.mxu0 %v3659_v42 }
 0xff1   : > { %v2417_v10 = vpack.c.bf16 %v2411_v9, %v2408_v2  ;;  %v2418_v11 = vpack.c.bf16 %v2414_v7, %v2414_v7  ;;  %v3668_v9 = vmov 683565275  }
 0xff3   : > { %3213 = vmatpush3.bf16.msra.mxu0 %v2417_v10  ;;  %v2428_v12 = vsel %vm2196_vm5, %v2418_v11, 0 }
 0xff4   : > { %3214 = vmatprep.subr.bf16.mxu0 %v3659_v42 }
 0xff7   : > { %3215 = vmatpush3.bf16.msra.mxu0 %v2428_v12  ;;  %v3669_v12 = vmov 2475754826  }
 0xffa   : > { %3217 = vmatmul.mubr.msk.bf16.vlgmr.msra.gmra.mrb[28].mxu0 %vm2343_vm7, %v2401_v14 }
0x1001   : > { %v2265_v15 = vpop.permute.xlu1 %2264  ;;  %v2422_v18 = vpop.permute.xlu0 %2421 }
0x1002   : > { %v3244_v16 = vadd.f32 %v2265_v15, %v4280_v41  ;;  %v3670_v15 = vmov 2131351028  }
0x1004   : > { %v3245_v17 = vadd.f32 %v3244_v16, %v2390_v59 }
0x1006   : > { %v3246_v13 = vadd.f32 %v3245_v17, %v2422_v18  ;;  %v3671_v17 = vmov 2102212464  }
0x10cd   : > { %v2464_v19 = vpop.f32.mrb[28].mxu0 }
0x10ce   : > { %v3247_v20 = vadd.f32 %v3246_v13, %v2464_v19  ;;  %v3218_v23 = vpop.f32.mrb[29].mxu0  ;;  %v3672_v13 = vmov 920167782  }
0x10cf   : > { %v2467_v24 = vpop.f32.mrb[30].mxu0 }
0x10d0   : > { %v2472_v26 = vmul.f32 0.5, %v3247_v20  ;;  %v3219_v27 = vpop.f32.mrb[31].mxu0 }
0x10d2   : > { %vm2473_vm13 = vcmp.ge.f32.partialorder %v2472_v26, 0.0  ;;  %v2474_v5 = vmul.f32 0.01, %v2472_v26 }
0x10d4   : > { %v2475_v28 = vsel %vm2473_vm13, %v2472_v26, %v2474_v5  ;;  %v3673_v5 = vmov 1326507024  }
0x10d5   : > { %2480 = vrot.lane.b32.xlu0 %v2475_v28, %s4514_s21  ;;  %2477 = vrot.lane.b32.xlu1 %v2475_v28, %s4513_s30  ;;  %s4517_s21 = smov 123  }
0x1147   : > { %v2481_v6 = vpop.permute.xlu0 %2480  ;;  %v2478_v29 = vpop.permute.xlu1 %2477 }
0x1148   : > { %v2483_v8 = vsel %vm1570_vm1, %v2478_v29, %v2481_v6  ;;  %vm2533_vm1 = vcmask 457728  }
0x1149   : > { %2485 = vrot.lane.b32.xlu1 %v2483_v8, %s4505_s3  ;;  %s4518_s3 = sld [smem:[#allocation3_spill]] }
0x114f   : > { %v2494_v33 = vld [vmem:[%s4518_s3 + $0x8] sm:$0x1]  ;;  %v2493_v34 = vld [vmem:[%s4518_s3] sm:$0xff] }
0x11bb   : > { %v2486_v30 = vpop.permute.xlu1 %2485 }
0x11bc   : > { %v2488_v31 = vsel %vm816_vm0, 0.0, %v2486_v30  ;;  %vm2941_vm0 = vmpackc.low %vm3667_vm10, %vm2489_vm2 }
0x11bd   : > { %v2490_v32 = vsel %vm2489_vm2, %v2488_v31, 0.0 }
0x11be   : > { %2499 = vrot.lane.b32.xlu1 %v2490_v32, %s4512_s6  ;;  %2496 = vrot.lane.b32.xlu0 %v2490_v32, %s4513_s30  ;;  %s4519_s6 = sld [smem:[#allocation4_spill]]  ;;  %s2955_s30 = sshll.u32 %s4523_s2, 4 }
0x11bf   : > { %s764_s5 = scalar_lea.vmem %s4452_s25, %s2955_s30 }
0x11c2   : > { %2505 = vrot.lane.b32.xlu1 %v2490_v32, %s4506_s9  ;;  %2502 = vrot.lane.b32.xlu0 %v2490_v32, %s4501_s4 }
0x11c4   : > { %v3633_v49 = vld [vmem:[%s4519_s6] sm:$0x1f]  }
0x11c6   : > { %2511 = vrot.lane.b32.xlu1 %v2490_v32, %s4516_s10  ;;  %2508 = vrot.lane.b32.xlu0 %v2490_v32, %s4517_s21 }
0x11ca   : > { %2525 = vperm.xlu1 %3472, %v2494_v33   ;;  %2520 = vperm.xlu0 %3473, %v2493_v34  }
0x1230   : > { %v2500_v35 = vpop.permute.xlu1 %2499  ;;  %v2497_v36 = vpop.permute.xlu0 %2496 }
0x1231   : > { %v2942_v39 = vpack.c.bf16 %v2497_v36, %v2488_v31 }
0x1233   : > { %3221 = vmatpush3.bf16.msk.msra.mxu1 %vm2941_vm0, %v2942_v39 }
0x1234   : > { %v2506_v45 = vpop.permute.xlu1 %2505  ;;  %v2503_v48 = vpop.permute.xlu0 %2502  ;;  %3222 = vmatprep.subr.bf16.mxu1 %v3659_v42 }
0x1235   : > { %v2515_v40 = vpack.c.bf16 %v2503_v48, %v2500_v35 }
0x1237   : > { %3223 = vmatpush3.bf16.msra.mxu1 %v2515_v40 }
0x1238   : > { %v2512_v41 = vpop.permute.xlu1 %2511  ;;  %v2509_v43 = vpop.permute.xlu0 %2508  ;;  %3224 = vmatprep.subr.bf16.mxu1 %v3659_v42 }
0x1239   : > { %v2516_v44 = vpack.c.bf16 %v2509_v43, %v2506_v45  ;;  %v2517_v46 = vpack.c.bf16 %v2512_v41, %v2512_v41 }
0x123b   : > { %3225 = vmatpush3.bf16.msra.mxu1 %v2516_v44  ;;  %v2538_v47 = vsel %vm2196_vm5, %v2517_v46, 0 }
0x123c   : > { %3226 = vmatprep.subr.bf16.mxu1 %v3659_v42 }
0x123f   : > { %3227 = vmatpush3.bf16.msra.mxu1 %v2538_v47 }
0x1242   : > { %3229 = vmatmul.mubr.msk.bf16.vlgmr.msra.gmra.mrb[28].mxu1 %vm2533_vm1, %v3633_v49 }
0x1249   : > { %v2521_v50 = vpop.permute.xlu0 %2520  ;;  %v2526_v21 = vpop.permute.xlu1 %2525 }
0x1315   : > { %v2574_v51 = vpop.f32.mrb[28].mxu1 }
0x1316   : > { %v4350_v52 = vadd.f32 %v2574_v51, %v2521_v50  ;;  %v3230_v59 = vpop.f32.mrb[29].mxu1 }
0x1317   : > { %v2577_v37 = vpop.f32.mrb[30].mxu1 }
0x1318   : > { %v2581_v22 = vand.u32 2147483647, %v4350_v52  ;;  %v2584_v42 = vand.u32 2139095040, %v4350_v52  ;;  %v3231_v53 = vpop.f32.mrb[31].mxu1  ;;  %v4354_v25 = vadd.f32 %v2577_v37, %v2526_v21  ;;  %vm2583_vm1 = vcmp.lt.s32.totalorder %v4350_v52, 0 }
0x131a   : > { %v2585_v54 = vshrl.u32 %v2584_v42, 23  ;;  %v2588_v55 = vand.u32 8388607, %v2581_v22  ;;  %v2688_v56 = vand.u32 2139095040, %v4354_v25  ;;  %v2685_v58 = vand.u32 2147483647, %v4354_v25 }
0x131c   : > { %v2945_v57 = vadd.s32 4294967169, %v2585_v54  ;;  %v2689_v60 = vshrl.u32 %v2688_v56, 23  ;;  %v2589_v62 = vor.u32 8388608, %v2588_v55  ;;  %v2692_v63 = vand.u32 8388607, %v2685_v58 }
0x131e   : > { %v2591_v61 = vadd.s32 1, %v2945_v57  ;;  %v2949_v38 = vadd.s32 4294967169, %v2689_v60  ;;  %v4362_v4 = vshll.u32 %v2589_v62, 8  ;;  %v2693_v11 = vor.u32 8388608, %v2692_v63 }
0x1320   : > { %vm2592_vm10 = vcmp.gt.s32.totalorder %v2591_v61, 0  ;;  %v2695_v1 = vadd.s32 1, %v2949_v38  ;;  %v2733_v46 = vshll.u32 %v2693_v11, 8 }
0x1321   : > { %v2593_v0 = vsel %vm2592_vm10, %v2591_v61, 0  ;;  %vm2582_vm10 = vcmp.le.f32.partialorder %v2581_v22, 0.7853982 }
0x1322   : > { %v2594_v2 = vshrl.u32 %v2593_v0, 5  ;;  %v2595_v3 = vand.u32 31, %v2593_v0  ;;  %vm2696_vm5 = vcmp.gt.s32.totalorder %v2695_v1, 0 }
0x1323   : > { %v2697_v30 = vsel %vm2696_vm5, %v2695_v1, 0  ;;  %vm2687_vm5 = vcmp.lt.s32.totalorder %v4354_v25, 0 }
0x1324   : > { %v2596_v7 = vsub.s32 32, %v2595_v3  ;;  %v2598_v10 = vshll.u32 %v3668_v9, %v2595_v3  ;;  %v2601_v14 = vshll.u32 %v3669_v12, %v2595_v3  ;;  %v2604_v16 = vshll.u32 %v3670_v15, %v2595_v3 }
0x1325   : > { %v2607_v18 = vshll.u32 %v3671_v17, %v2595_v3  ;;  %v2610_v19 = vshll.u32 %v3672_v13, %v2595_v3  ;;  %vm2613_vm6 = vcmp.lt.s32.totalorder %v2594_v2, 1  ;;  %vm2615_vm4 = vcmp.lt.s32.totalorder %v2594_v2, 3 }
0x1326   : > { %v2599_v20 = vshrl.u32 %v3669_v12, %v2596_v7  ;;  %v2602_v23 = vshrl.u32 %v3670_v15, %v2596_v7  ;;  %v2605_v24 = vshrl.u32 %v3671_v17, %v2596_v7  ;;  %v2597_v26 = vshrl.u32 %v3668_v9, %v2596_v7 }
0x1327   : > { %v2608_v27 = vshrl.u32 %v3672_v13, %v2596_v7  ;;  %v2611_v28 = vshrl.u32 %v3673_v5, %v2596_v7  ;;  %vm2616_vm7 = vcmp.lt.s32.totalorder %v2594_v2, 4  ;;  %v2699_v33 = vand.u32 31, %v2697_v30 }
0x1328   : > { %v2600_v6 = vor.u32 %v2599_v20, %v2598_v10  ;;  %v2603_v29 = vor.u32 %v2602_v23, %v2601_v14  ;;  %v2606_v8 = vor.u32 %v2605_v24, %v2604_v16  ;;  %vm2614_vm8 = vcmp.lt.s32.totalorder %v2594_v2, 2 }
0x1329   : > { %v2609_v31 = vor.u32 %v2608_v27, %v2607_v18  ;;  %v2612_v32 = vor.u32 %v2611_v28, %v2610_v19  ;;  %v2700_v41 = vsub.s32 32, %v2699_v33  ;;  %v2698_v51 = vshrl.u32 %v2697_v30, 5 }
0x132a   : > { %v2617_v34 = vsel %vm2613_vm6, %v2597_v26, %v2600_v6  ;;  %v2618_v35 = vsel %vm2616_vm7, %v2606_v8, 2102212464  ;;  %v2621_v36 = vsel %vm2613_vm6, %v2600_v6, %v2603_v29  ;;  %v2625_v39 = vsel %vm2613_vm6, %v2603_v29, %v2606_v8 }
0x132b   : > { %v2619_v45 = vsel %vm2615_vm4, %v2603_v29, %v2618_v35  ;;  %v2622_v48 = vsel %vm2616_vm7, %v2609_v31, 920167782  ;;  %v2626_v40 = vsel %vm2616_vm7, %v2612_v32, 1326507024  ;;  %v2702_v53 = vshll.u32 %v3668_v9, %v2699_v33 }
0x132c   : > { %v2623_v43 = vsel %vm2615_vm4, %v2606_v8, %v2622_v48  ;;  %v2627_v44 = vsel %vm2615_vm4, %v2609_v31, %v2626_v40  ;;  %v2620_v47 = vsel %vm2614_vm8, %v2617_v34, %v2619_v45  ;;  %v2703_v54 = vshrl.u32 %v3669_v12, %v2700_v41 }
0x132d   : > { %v2624_v49 = vsel %vm2614_vm8, %v2621_v36, %v2623_v43  ;;  %v2628_v50 = vsel %vm2614_vm8, %v2625_v39, %v2627_v44  ;;  %v2705_v55 = vshll.u32 %v3669_v12, %v2699_v33  ;;  %v2706_v56 = vshrl.u32 %v3670_v15, %v2700_v41 }
0x132e   : > { %v4374_v59 = vmul.u32.u64.low %v4362_v4, %v2628_v50  ;;  %v4375_v37 = vmul.u32.u64.high %v4362_v4, %v2628_v50, %v4374_v59  ;;  %v4378_v21 = vmul.u32.u64.low %v4362_v4, %v2624_v49  ;;  %v4379_v42 = vmul.u32.u64.high %v4362_v4, %v2624_v49, %v4378_v21 }
0x132f   : > { %v2708_v57 = vshll.u32 %v3670_v15, %v2699_v33  ;;  %v2709_v60 = vshrl.u32 %v3671_v17, %v2700_v41  ;;  %v2711_v61 = vshll.u32 %v3671_v17, %v2699_v33  ;;  %v2712_v62 = vshrl.u32 %v3672_v13, %v2700_v41 }
0x1330   : > { %v2704_v38 = vor.u32 %v2703_v54, %v2702_v53  ;;  %v2707_v63 = vor.u32 %v2706_v56, %v2705_v55  ;;  %v2714_v0 = vshll.u32 %v3672_v13, %v2699_v33  ;;  %v2715_v1 = vshrl.u32 %v3673_v5, %v2700_v41 }
0x1331   : > { %v2636_v2 = vmul.u32 %v4362_v4, %v2620_v47  ;;  %vm2638_vm3 = vc.u32 %v4375_v37, %v4378_v21  ;;  %v2639_v3 = vadd.s32 1, %v4379_v42  ;;  %v2710_v7 = vor.u32 %v2709_v60, %v2708_v57 }
0x1332   : > { %v2701_v10 = vshrl.u32 %v3668_v9, %v2700_v41  ;;  %v2713_v11 = vor.u32 %v2712_v62, %v2711_v61  ;;  %v2716_v12 = vor.u32 %v2715_v1, %v2714_v0  ;;  %vm2717_vm11 = vcmp.lt.s32.totalorder %v2698_v51, 1 }
0x1333   : > { %v2640_v14 = vsel %vm2638_vm3, %v2639_v3, %v4379_v42  ;;  %vm2719_vm12 = vcmp.lt.s32.totalorder %v2698_v51, 3  ;;  %vm2720_vm14 = vcmp.lt.s32.totalorder %v2698_v51, 4  ;;  %v2725_v15 = vsel %vm2717_vm11, %v2704_v38, %v2707_v63 }
0x1334   : > { %v2641_v16 = vadd.s32 %v2640_v14, %v2636_v2  ;;  %v2722_v17 = vsel %vm2720_vm14, %v2710_v7, 2102212464  ;;  %v2726_v18 = vsel %vm2720_vm14, %v2713_v11, 920167782  ;;  %v2729_v4 = vsel %vm2717_vm11, %v2707_v63, %v2710_v7 }
0x1335   : > { %vm2718_vm15 = vcmp.lt.s32.totalorder %v2698_v51, 2  ;;  %v2721_v13 = vsel %vm2717_vm11, %v2701_v10, %v2704_v38  ;;  %v2727_v19 = vsel %vm2719_vm12, %v2710_v7, %v2726_v18  ;;  %v2730_v20 = vsel %vm2720_vm14, %v2716_v12, 1326507024 }
0x1336   : > { %v2642_v23 = vadd.s32 536870912, %v2641_v16  ;;  %v2723_v24 = vsel %vm2719_vm12, %v2707_v63, %v2722_v17  ;;  %v2728_v26 = vsel %vm2718_vm15, %v2725_v15, %v2727_v19  ;;  %v2731_v9 = vsel %vm2719_vm12, %v2713_v11, %v2730_v20 }
0x1337   : > { %v2732_v27 = vsel %vm2718_vm15, %v2729_v4, %v2731_v9  ;;  %v4389_v5 = vmul.u32.u64.low %v2733_v46, %v2728_v26  ;;  %v4390_v28 = vmul.u32.u64.high %v2733_v46, %v2728_v26, %v4389_v5  ;;  %v2724_v30 = vsel %vm2718_vm15, %v2721_v13, %v2723_v24 }
0x1338   : > { %v2643_v6 = vshrl.u32 %v2642_v23, 30  ;;  %v4392_v29 = vmul.u32.u64.low %v2733_v46, %v2732_v27  ;;  %v4393_v8 = vmul.u32.u64.high %v2733_v46, %v2732_v27, %v4392_v29  ;;  %v2740_v34 = vmul.u32 %v2733_v46, %v2724_v30 }
0x1339   : > { %v2743_v32 = vadd.s32 1, %v4390_v28  ;;  %v2637_v50 = vadd.s32 %v4378_v21, %v4375_v37  ;;  %vm4408_vm6 = vcmp.le.f32.partialorder %v2685_v58, 0.7853982  ;;  %vm2673_vm3 = vweird.f32 %v4350_v52 }
0x133a   : > { %v2644_v31 = vshll.u32 %v2643_v6, 30  ;;  %vm2742_vm13 = vc.u32 %v4393_v8, %v4389_v5  ;;  %v2667_v1 = vsub.s32 4, %v2643_v6  ;;  %v2741_v37 = vadd.s32 %v4389_v5, %v4393_v8 }
0x133b   : > { %v2744_v35 = vsel %vm2742_vm13, %v2743_v32, %v4390_v28  ;;  %vm2790_vm15 = vcmask 262144   ;;  %vm2777_vm13 = vweird.f32 %v4354_v25 }
0x133c   : > { %v2645_v33 = vsub.s32 %v2641_v16, %v2644_v31  ;;  %v2745_v39 = vadd.s32 %v2744_v35, %v2740_v34  ;;  %v2668_v15 = vsel %vm2583_vm1, %v2667_v1, %v2643_v6 }
0x133d   : > { %v2670_v4 = vsel %vm2582_vm10, 0, %v2668_v15 }
0x133e   : > { %v2647_v36 = vsub.s32 0, %v2645_v33  ;;  %v2746_v48 = vadd.s32 536870912, %v2745_v39  ;;  %v2674_v23 = vadd.s32 3, %v2670_v4 }
0x1340   : > { %v2946_v45 = vmin.u32 %v2647_v36, %v2645_v33  ;;  %v2747_v41 = vshrl.u32 %v2746_v48, 30  ;;  %v2675_v27 = vand.u32 3, %v2674_v23 }
0x1342   : > { %v2649_v40 = vclz %v2946_v45  ;;  %v2748_v44 = vshll.u32 %v2747_v41, 30  ;;  %v2771_v26 = vsub.s32 4, %v2747_v41  ;;  %vm2680_vm4 = vcmp.eq.s32.totalorder %v2675_v27, 2 }
0x1343   : > { %vm2677_vm7 = vcmp.eq.s32.totalorder %v2675_v27, 0  ;;  %vm2676_vm8 = vcmp.lt.s32.totalorder %v2675_v27, 2 }
0x1344   : > { %v2947_v43 = vadd.s32 4294967294, %v2649_v40  ;;  %v2749_v49 = vsub.s32 %v2745_v39, %v2748_v44  ;;  %v2772_v28 = vsel %vm2687_vm5, %v2771_v26, %v2747_v41 }
0x1345   : > { %v2774_v32 = vsel %vm4408_vm6, 0, %v2772_v28 }
0x1346   : > { %vm2948_vm2 = vcmp.lt.s32.totalorder %v2947_v43, 0  ;;  %v2751_v59 = vsub.s32 0, %v2749_v49  ;;  %v2778_v35 = vadd.s32 3, %v2774_v32 }
0x1347   : > { %v2652_v47 = vsel %vm2948_vm2, 0, %v2947_v43 }
0x1348   : > { %v2653_v51 = vsub.s32 32, %v2652_v47  ;;  %v2657_v46 = vsub.s32 4294967266, %v2652_v47  ;;  %v2654_v42 = vshll.u32 %v2645_v33, %v2652_v47  ;;  %v2950_v55 = vmin.u32 %v2751_v59, %v2749_v49 }
0x1349   : > { %v2779_v39 = vand.u32 3, %v2778_v35 }
0x134a   : > { %v2655_v53 = vshrl.u32 %v2637_v50, %v2653_v51  ;;  %v2658_v54 = vadd.s32 127, %v2657_v46  ;;  %v2753_v60 = vclz %v2950_v55 }
0x134b   : > { %vm2784_vm11 = vcmp.eq.s32.totalorder %v2779_v39, 2  ;;  %vm2781_vm12 = vcmp.eq.s32.totalorder %v2779_v39, 0  ;;  %vm2780_vm14 = vcmp.lt.s32.totalorder %v2779_v39, 2 }
0x134c   : > { %v2656_v56 = vor.u32 %v2655_v53, %v2654_v42  ;;  %v2659_v57 = vshll.u32 %v2658_v54, 23  ;;  %v2951_v62 = vadd.s32 4294967294, %v2753_v60 }
0x134e   : > { %v2660_v61 = vor.u32 4788187, %v2659_v57  ;;  %v2663_v63 = vcvt.s32.f32 %v2656_v56  ;;  %vm2952_vm0 = vcmp.lt.s32.totalorder %v2951_v62, 0 }
0x134f   : > { %v2756_v2 = vsel %vm2952_vm0, 0, %v2951_v62 }
0x1350   : > { %v2661_v38 = vand.u32 2147483647, %v2660_v61  ;;  %v2757_v21 = vsub.s32 32, %v2756_v2  ;;  %v2761_v3 = vsub.s32 4294967266, %v2756_v2  ;;  %v2758_v10 = vshll.u32 %v2749_v49, %v2756_v2 }
0x1352   : > { %v2664_v0 = vmul.f32 %v2663_v63, %v2661_v38  ;;  %v2759_v11 = vshrl.u32 %v2741_v37, %v2757_v21  ;;  %v2762_v12 = vadd.s32 127, %v2761_v3 }
0x1354   : > { %v2665_v7 = vxor.u32 2147483648, %v2664_v0  ;;  %v2760_v17 = vor.u32 %v2759_v11, %v2758_v10  ;;  %v2763_v18 = vshll.u32 %v2762_v12, 23 }
0x1356   : > { %v2666_v14 = vsel %vm2583_vm1, %v2665_v7, %v2664_v0  ;;  %v2764_v13 = vor.u32 4788187, %v2763_v18  ;;  %v2767_v20 = vcvt.s32.f32 %v2760_v17 }
0x1357   : > { %v2669_v16 = vsel %vm2582_vm10, %v4350_v52, %v2666_v14 }
0x1358   : > { %3634 = vcosq.f32 %v2669_v16  ;;  %v2765_v19 = vand.u32 2147483647, %v2764_v13 }
0x1359   : > { %3636 = vsinq.f32 %v2669_v16 }
0x135a   : > { %v2768_v24 = vmul.f32 %v2767_v20, %v2765_v19 }
0x135c   : > { %v2769_v9 = vxor.u32 2147483648, %v2768_v24 }
0x135e   : > { %v2770_v5 = vsel %vm2687_vm5, %v2769_v9, %v2768_v24 }
0x135f   : > { %v2773_v29 = vsel %vm4408_vm6, %v4354_v25, %v2770_v5 }
0x1360   : > { %3638 = vcosq.f32 %v2773_v29 }
0x1361   : > { %3640 = vsinq.f32 %v2773_v29 }
0x1362   : > { %v3635_v6 = vpop.eup %3634 }
0x1363   : > { %v3637_v8 = vpop.eup %3636  ;;  %v2681_v30 = vxor.u32 2147483648, %v3635_v6 }
0x1364   : > { %v2678_v31 = vxor.u32 2147483648, %v3637_v8 }
0x1365   : > { %v2682_v58 = vsel %vm2680_vm4, %v2681_v30, %v3637_v8 }
0x1366   : > { %v2679_v33 = vsel %vm2677_vm7, %v3635_v6, %v2678_v31 }
0x1367   : > { %v2683_v34 = vsel %vm2676_vm8, %v2679_v33, %v2682_v58 }
0x1368   : > { %v2684_v36 = vsel %vm2673_vm3, nan, %v2683_v34 }
0x1369   : > { %2789 = vst.msk [vmem:[%s764_s5] sm:$0xff] %vm2089_vm9, %v2684_v36 }
0x136a   : > { %v3639_v45 = vpop.eup %3638 }
0x136b   : > { %v3641_v48 = vpop.eup %3640  ;;  %v2785_v40 = vxor.u32 2147483648, %v3639_v45 }
0x136c   : > { %v2782_v41 = vxor.u32 2147483648, %v3641_v48 }
0x136d   : > { %v2786_v43 = vsel %vm2784_vm11, %v2785_v40, %v3641_v48 }
0x136e   : > { %v2783_v44 = vsel %vm2781_vm12, %v3639_v45, %v2782_v41 }
0x136f   : > { %v2787_v47 = vsel %vm2780_vm14, %v2783_v44, %v2786_v43 }
0x1370   : > { %v2788_v52 = vsel %vm2777_vm13, nan, %v2787_v47 }
0x1371   : > { %2791 = vst.msk [vmem:[%s764_s5 + $0x8] sm:$0x1] %vm2790_vm15, %v2788_v52 }
0x1372 PF: > { %s35_s29 = sadd.s32 1, %s3648_s29  }
0x1373   : > { %p32_p4 = scmp.ge.s32.totalorder %s35_s29, 4  }
0x1375   :  { %34 = sbr.rel (!%p32_p4) target bundleno = 13 (0xd), region = 150 }

</bundles_post_ra>
